<compile_context>
chip_gen: v7x
topology: tpu7x:2x2x1
jax: 0.10.0
libtpu: 0.0.40
codegen_flags: <defaults>
</compile_context>

<pallas_src>
import functools

import jax
import jax.numpy as jnp
from jax.experimental import pallas as pl
from jax.experimental.pallas import tpu as pltpu


def _vmem_capacity_bytes():
    try:
        return int(pltpu.get_tpu_info().vmem_capacity_bytes)
    except Exception:
        return 64 * 1024 * 1024  # conservative default (v7x per-core VMEM)


def _pick_hw_block(hw, c1, hid, feat_blk, vmem_limit, max_blk_hw=None):
    """Largest HW tile (multiple of 128, preferring 256 for the 256-wide MXU on
    v6e/v7x) whose actual per-step VMEM residency fits the budget."""
    # Resident operands (single-buffered weights) + accumulator scratch.
    resident = hid * c1 * 2              # [W1|b1] bf16
    resident += feat_blk * hid * 2       # W2 block bf16
    resident += feat_blk * 128 * 4       # b2 (lane-padded to 128) f32
    resident += feat_blk * 128 * 4       # GAP accumulator scratch f32
    headroom = 4 * 1024 * 1024           # compiler scratch / spills / output
    budget = vmem_limit - resident - headroom
    # Bytes in flight per HW pixel: x tile (bf16, double-buffered), h (f32 +
    # bf16 copy for matmul2), f (f32, x2 slack for bias/ReLU/mask temporaries).
    per_px = c1 * 2 * 2 + hid * (4 + 2) + feat_blk * (4 + 4)
    max_blk = budget // per_px if budget > 0 else 128
    if max_blk_hw is not None:
        max_blk = min(max_blk, max_blk_hw)
    gran = 256 if max_blk >= 256 else 128
    max_blk = max(128, (max_blk // gran) * gran)
    hw_ceil = -(-hw // 128) * 128
    return int(min(max_blk, hw_ceil))


def _incv3_feature_kernel(x_ref, w1_ref, w2_ref, b2_ref, o_ref, acc_ref, *,
                          inv_hw, blk_hw, valid_last):
    # x_ref:  (1, C+1, blk_hw) bf16   one batch element's HW chunk (+ ones row)
    # w1_ref: (HID, C+1)  bf16        [W1 | b1]
    # w2_ref: (FBLK, HID) bf16
    # b2_ref: (FBLK, 1)   f32
    # o_ref:  (1, 1, FBLK) f32        pooled features, lane-dense, stored at k==last
    # acc_ref:(FBLK, 128)  f32        lane-dense GAP partial sums across HW chunks
    k = pl.program_id(2)
    n_k = pl.num_programs(2)
    n_sub = blk_hw // 128

    @pl.when(k == 0)
    def _init():
        acc_ref[...] = jnp.zeros_like(acc_ref)

    x = x_ref[0]                                             # (C+1, blk_hw) bf16

    # 1x1 conv #1 (bias folded into the matmul via the ones channel): MXU, f32 acc.
    h = jnp.dot(w1_ref[...], x, preferred_element_type=jnp.float32)
    h = jnp.maximum(h, 0.0)

    # 1x1 conv #2: bf16 in / f32 out on the MXU; bias + ReLU on the VPU.
    f = jnp.dot(w2_ref[...], h.astype(jnp.bfloat16),
                preferred_element_type=jnp.float32)
    f = jnp.maximum(f + b2_ref[...], 0.0)                    # (FBLK, blk_hw)

    def accumulate(valid):
        # Lane-dense partial GAP: fold blk_hw lanes into 128 bins with plain VPU
        # adds (no per-chunk XLU reduce, no width-1 masked RMW). `valid` is a
        # static column count; padded columns of the last chunk are masked out.
        total = None
        for s in range(n_sub):
            lo = s * 128
            if valid <= lo:
                break
            part = f[:, lo:lo + 128]
            if valid < lo + 128:
                lane = jax.lax.broadcasted_iota(jnp.int32, (1, 128), 1)
                part = jnp.where(lane < (valid - lo), part, 0.0)
            total = part if total is None else total + part
        acc_ref[...] += total

    if valid_last == blk_hw:
        accumulate(blk_hw)
    else:
        @pl.when(k != n_k - 1)
        def _acc_full():
            accumulate(blk_hw)

        @pl.when(k == n_k - 1)
        def _acc_masked():
            accumulate(valid_last)

    @pl.when(k == n_k - 1)
    def _finalize():
        # One XLU transpose + sublane reduce per (batch, feat-block); the pooled
        # row lands lane-dense in the (1, FBLK) output block.
        pooled = jnp.sum(acc_ref[...].T, axis=0, keepdims=True) * inv_hw
        o_ref[0] = pooled


def incv3_features(x_nchw, params, *, max_blk_hw=None):
    """Synthetic fid_incv3: returns [feature_map] with shape (N, FEAT, 1, 1)."""
    w1t, b1, w2t, b2 = params
    N, C, H, W = x_nchw.shape
    HW = H * W
    HID = w1t.shape[0]
    FEAT = w2t.shape[0]

    # Megacore guard (v7x has 2 TensorCores): with an odd batch count, split FEAT
    # into two parallel blocks so both cores stay busy. Harmless on 1-TC parts
    # (the recomputed matmul1 has K=C and is negligible vs matmul2).
    n_fblk = 2 if (FEAT % 256 == 0 and N % 2 == 1) else 1
    fblk = FEAT // n_fblk

    vmem_cap = _vmem_capacity_bytes()
    vmem_limit = min(96 * 1024 * 1024, vmem_cap * 3 // 4)  # 96 MiB (v5e/v6e), 48 MiB (v7x)

    c1 = C + 1
    blk_hw = _pick_hw_block(HW, c1, HID, fblk, vmem_limit, max_blk_hw)
    n_chunks = -(-HW // blk_hw)
    hw_pad = n_chunks * blk_hw
    valid_last = HW - (n_chunks - 1) * blk_hw

    # NCHW -> (N, C, H*W) is a free reshape (spatial axis on the 128 lanes).
    # Cast to bf16 (halves x HBM traffic + tile VMEM), fold the layer-1 bias by
    # appending a ones channel, and zero-pad HW up to a multiple of the tile.
    x_chw = x_nchw.reshape(N, C, HW).astype(jnp.bfloat16)
    ones_ch = jnp.ones((N, 1, HW), jnp.bfloat16)
    x_ext = jnp.concatenate([x_chw, ones_ch], axis=1)        # (N, C+1, HW)
    if hw_pad != HW:
        x_ext = jnp.pad(x_ext, ((0, 0), (0, 0), (0, hw_pad - HW)))
    w1_ext = jnp.concatenate(
        [w1t.astype(jnp.bfloat16), b1.astype(jnp.bfloat16)], axis=1)  # (HID, C+1)

    kernel = functools.partial(_incv3_feature_kernel, inv_hw=1.0 / float(HW),
                               blk_hw=blk_hw, valid_last=valid_last)

    def call(single_buffer_weights):
        # Resident operands are fetched once; single-buffering them halves their
        # VMEM footprint (2048x2048 bf16 on v7x: 16 MiB -> 8 MiB). w2/b2 keep the
        # default double buffer when their block index changes (FEAT split).
        res_kw = ({"pipeline_mode": pl.Buffered(1)}
                  if single_buffer_weights else {})
        w2_kw = res_kw if n_fblk == 1 else {}
        grid_spec = pltpu.PrefetchScalarGridSpec(
            num_scalar_prefetch=0,
            grid=(N, n_fblk, n_chunks),                  # reduction (HW) axis last
            in_specs=[
                pl.BlockSpec((1, c1, blk_hw), lambda i, j, k: (i, 0, k)),
                pl.BlockSpec((HID, c1), lambda i, j, k: (0, 0), **res_kw),
                pl.BlockSpec((fblk, HID), lambda i, j, k: (j, 0), **w2_kw),
                pl.BlockSpec((fblk, 1), lambda i, j, k: (j, 0), **w2_kw),
            ],
            out_specs=pl.BlockSpec((1, 1, fblk), lambda i, j, k: (i, 0, j)),
            scratch_shapes=[pltpu.VMEM((fblk, 128), jnp.float32)],
        )
        return pl.pallas_call(
            kernel,
            out_shape=jax.ShapeDtypeStruct((N, 1, FEAT), jnp.float32),
            grid_spec=grid_spec,
            compiler_params=pltpu.CompilerParams(
                dimension_semantics=("parallel", "parallel", "arbitrary"),
                vmem_limit_bytes=vmem_limit,
            ),
        )(x_ext, w1_ext, w2t, b2)

    try:
        pooled = call(True)
    except Exception:
        # This Pallas version rejects pl.Buffered(1) for these specs; fall back
        # to the default double-buffered resident weights (identical math).
        pooled = call(False)

    # (N, 1, FEAT) -> (N, FEAT, 1, 1): matches pytorch-fid's pool3 output layout.
    return [pooled.reshape(N, FEAT, 1, 1)]


def wrapper_inception_v3_forward(x_nchw, params, **kw):
    """Exact semantics of WrapperInceptionV3.forward (with the synthetic trunk)."""
    y = incv3_features(x_nchw, params, **kw)   # y = self.fid_incv3(x)
    y = y[0]                                   # y = y[0]
    y = y[:, :, 0, 0]                          # y = y[:, :, 0, 0]
    return y


def init_params(key, c_in, hidden, feat):
    k1, k2, k3, k4 = jax.random.split(key, 4)
    # Weights stored transposed (out_ch, in_ch) so the kernel consumes them
    # directly, in bf16 for the MXU.
    w1t = (jax.random.normal(k1, (hidden, c_in), jnp.float32) * 0.1).astype(jnp.bfloat16)
    b1 = jax.random.normal(k2, (hidden, 1), jnp.float32) * 0.01
    w2t = (jax.random.normal(k3, (feat, hidden), jnp.float32) * 0.1).astype(jnp.bfloat16)
    b2 = jax.random.normal(k4, (feat, 1), jnp.float32) * 0.01
    return w1t, b1, w2t, b2


def _reference_forward(x_nchw, params):
    """Pure-JAX f32 reference of the same synthetic trunk + wrapper slice."""
    w1t, b1, w2t, b2 = params
    N, C, H, W = x_nchw.shape
    x = jnp.transpose(x_nchw, (0, 2, 3, 1)).reshape(N, H * W, C)
    h = jnp.maximum(x @ w1t.astype(jnp.float32).T + b1[:, 0], 0.0)
    f = jnp.maximum(h @ w2t.astype(jnp.float32).T + b2[:, 0], 0.0)
    return jnp.mean(f, axis=1)


if __name__ == "__main__":
    key = jax.random.PRNGKey(0)
    kx1, kp1, kx2, kp2 = jax.random.split(key, 4)

    # Test 1: spec-scale NCHW batch. HIDDEN/FEAT stand in for InceptionV3's
    # 2048-d pool3 features, multiples of 128 so the feature axis is lane-dense.
    N, C, H, W = 2, 4, 16, 16
    HIDDEN, FEAT = 128, 128
    x = jax.random.normal(kx1, (N, C, H, W), jnp.float32)
    params = init_params(kp1, C, HIDDEN, FEAT)
    y = jax.block_until_ready(wrapper_inception_v3_forward(x, params))
    assert y.shape == (N, FEAT), y.shape
    y_ref = _reference_forward(x, params)
    assert jnp.allclose(y, y_ref, rtol=1e-1, atol=5e-2), (
        float(jnp.max(jnp.abs(y - y_ref))))

    # Test 2: ragged spatial size (17*17=289, no 128-multiple divisor — the case
    # that previously forced an uncompilable single-block fallback), odd batch
    # (exercises the FEAT megacore split) and a forced 128-wide HW tile
    # (exercises multi-chunk accumulation + last-chunk masking).
    N2, C2, H2, W2 = 1, 3, 17, 17
    HID2, FEAT2 = 128, 256
    x2 = jax.random.normal(kx2, (N2, C2, H2, W2), jnp.float32)
    params2 = init_params(kp2, C2, HID2, FEAT2)
    y2 = jax.block_until_ready(
        wrapper_inception_v3_forward(x2, params2, max_blk_hw=128))
    assert y2.shape == (N2, FEAT2), y2.shape
    y2_ref = _reference_forward(x2, params2)
    assert jnp.allclose(y2, y2_ref, rtol=1e-1, atol=5e-2), (
        float(jnp.max(jnp.abs(y2 - y2_ref))))

    print("KERNEL_OK")
</pallas_src>

<mosaic_0001>
module attributes {stable_mosaic.version = 11 : i64} {
  func.func @_incv3_feature_kernel(%arg0: i32, %arg1: i32, %arg2: i32, %arg3: memref<1x5x256xbf16, #tpu.memory_space<vmem>>, %arg4: memref<128x5xbf16, #tpu.memory_space<vmem>>, %arg5: memref<128x128xbf16, #tpu.memory_space<vmem>>, %arg6: memref<128x1xf32, #tpu.memory_space<vmem>>, %arg7: memref<1x1x128xf32, #tpu.memory_space<vmem>>, %arg8: memref<128x128xf32, #tpu.memory_space<vmem>>) attributes {dimension_semantics = [#tpu.dimension_semantics<parallel>, #tpu.dimension_semantics<parallel>, #tpu.dimension_semantics<arbitrary>], iteration_bounds = array<i64: 2, 1, 1>, scalar_prefetch = 0 : i64, scratch_operands = 1 : i64, tpu.core_type = #tpu.core_type<tc>, window_params = [{transform_indices = @transform_0, window_bounds = array<i64: 1, 5, 256>}, {pipeline_mode = #tpu.pipeline_mode<synchronous>, transform_indices = @transform_1, window_bounds = array<i64: 128, 5>}, {pipeline_mode = #tpu.pipeline_mode<synchronous>, transform_indices = @transform_2, window_bounds = array<i64: 128, 128>}, {pipeline_mode = #tpu.pipeline_mode<synchronous>, transform_indices = @transform_3, window_bounds = array<i64: 128, 1>}, {transform_indices = @transform_4, window_bounds = array<i64: 1, 1, 128>}]} {
    %c0_i32 = arith.constant 0 : i32
    %0 = arith.cmpi eq, %arg2, %c0_i32 : i32
    %1 = arith.extui %0 : i1 to i32
    %c0_i32_0 = arith.constant 0 : i32
    %2 = arith.cmpi ne, %1, %c0_i32_0 : i32
    scf.if %2 {
      %cst_18 = arith.constant 0.000000e+00 : f32
      %26 = vector.broadcast %cst_18 : f32 to vector<128x128xf32>
      %c0_19 = arith.constant 0 : index
      %c0_20 = arith.constant 0 : index
      %27 = vector.load %arg8[%c0_19, %c0_20] : memref<128x128xf32, #tpu.memory_space<vmem>>, vector<128x128xf32>
      tpu.vector_store %arg8[%c0_19, %c0_20], %26 {strides = array<i32>} : memref<128x128xf32, #tpu.memory_space<vmem>>, vector<128x128xf32>,
    } else {
    }
    %c0 = arith.constant 0 : index
    %c0_1 = arith.constant 0 : index
    %c0_2 = arith.constant 0 : index
    %3 = vector.load %arg3[%c0, %c0_1, %c0_2] : memref<1x5x256xbf16, #tpu.memory_space<vmem>>, vector<1x5x256xbf16>
    %4 = vector.shape_cast %3 : vector<1x5x256xbf16> to vector<5x256xbf16>
    %c0_3 = arith.constant 0 : index
    %c0_4 = arith.constant 0 : index
    %5 = vector.load %arg4[%c0_3, %c0_4] : memref<128x5xbf16, #tpu.memory_space<vmem>>, vector<128x5xbf16>
    %cst = arith.constant dense<0.000000e+00> : vector<128x256xf32>
    %6 = tpu.matmul %5, %4, %cst {dimension_numbers = #tpu.dot_dimension_numbers<[1], [0], [0], [1], [0, 0, 1, 1], [], []>} : vector<128x5xbf16>, vector<5x256xbf16>, vector<128x256xf32> -> vector<128x256xf32>
    %cst_5 = arith.constant 0.000000e+00 : f32
    %7 = vector.broadcast %cst_5 : f32 to vector<128x256xf32>
    %8 = arith.maximumf %6, %7 : vector<128x256xf32>
    %c0_6 = arith.constant 0 : index
    %c0_7 = arith.constant 0 : index
    %9 = vector.load %arg5[%c0_6, %c0_7] : memref<128x128xbf16, #tpu.memory_space<vmem>>, vector<128x128xbf16>
    %10 = arith.truncf %8 : vector<128x256xf32> to vector<128x256xbf16>
    %cst_8 = arith.constant dense<0.000000e+00> : vector<128x256xf32>
    %11 = tpu.matmul %9, %10, %cst_8 {dimension_numbers = #tpu.dot_dimension_numbers<[1], [0], [0], [1], [0, 0, 1, 1], [], []>} : vector<128x128xbf16>, vector<128x256xbf16>, vector<128x256xf32> -> vector<128x256xf32>
    %c0_9 = arith.constant 0 : index
    %c0_10 = arith.constant 0 : index
    %12 = vector.load %arg6[%c0_9, %c0_10] : memref<128x1xf32, #tpu.memory_space<vmem>>, vector<128x1xf32>
    %13 = vector.broadcast %12 : vector<128x1xf32> to vector<128x256xf32>
    %14 = arith.addf %11, %13 : vector<128x256xf32>
    %cst_11 = arith.constant 0.000000e+00 : f32
    %15 = vector.broadcast %cst_11 : f32 to vector<128x256xf32>
    %16 = arith.maximumf %14, %15 : vector<128x256xf32>
    %17 = vector.extract_strided_slice %16 {offsets = [0, 0], sizes = [128, 128], strides = [1, 1]} : vector<128x256xf32> to vector<128x128xf32>
    %18 = vector.extract_strided_slice %16 {offsets = [0, 128], sizes = [128, 128], strides = [1, 1]} : vector<128x256xf32> to vector<128x128xf32>
    %19 = arith.addf %17, %18 : vector<128x128xf32>
    %c0_12 = arith.constant 0 : index
    %c0_13 = arith.constant 0 : index
    %20 = vector.load %arg8[%c0_12, %c0_13] : memref<128x128xf32, #tpu.memory_space<vmem>>, vector<128x128xf32>
    %21 = arith.addf %20, %19 : vector<128x128xf32>
    %c0_14 = arith.constant 0 : index
    %c0_15 = arith.constant 0 : index
    %22 = vector.load %arg8[%c0_14, %c0_15] : memref<128x128xf32, #tpu.memory_space<vmem>>, vector<128x128xf32>
    tpu.vector_store %arg8[%c0_14, %c0_15], %21 {strides = array<i32>} : memref<128x128xf32, #tpu.memory_space<vmem>>, vector<128x128xf32>,
    %c0_i32_16 = arith.constant 0 : i32
    %23 = arith.cmpi eq, %arg2, %c0_i32_16 : i32
    %24 = arith.extui %23 : i1 to i32
    %c0_i32_17 = arith.constant 0 : i32
    %25 = arith.cmpi ne, %24, %c0_i32_17 : i32
    scf.if %25 {
      %c0_18 = arith.constant 0 : index
      %c0_19 = arith.constant 0 : index
      %26 = vector.load %arg8[%c0_18, %c0_19] : memref<128x128xf32, #tpu.memory_space<vmem>>, vector<128x128xf32>
      %27 = tpu.transpose %26, [1, 0] : vector<128x128xf32> -> vector<128x128xf32>
      %cst_20 = arith.constant dense<0.000000e+00> : vector<128xf32>
      %28 = vector.multi_reduction <add>, %27, %cst_20 [0] : vector<128x128xf32> to vector<128xf32>
      %29 = vector.shape_cast %28 : vector<128xf32> to vector<1x128xf32>
      %cst_21 = arith.constant 3.906250e-03 : f32
      %30 = vector.broadcast %cst_21 : f32 to vector<1x128xf32>
      %31 = arith.mulf %29, %30 : vector<1x128xf32>
      %c0_22 = arith.constant 0 : index
      %c0_23 = arith.constant 0 : index
      %c0_24 = arith.constant 0 : index
      %32 = vector.load %arg7[%c0_22, %c0_23, %c0_24] : memref<1x1x128xf32, #tpu.memory_space<vmem>>, vector<1x1x128xf32>
      %33 = vector.shape_cast %32 : vector<1x1x128xf32> to vector<1x128xf32>
      %34 = vector.shape_cast %31 : vector<1x128xf32> to vector<1x1x128xf32>
      tpu.vector_store %arg7[%c0_22, %c0_23, %c0_24], %34 {strides = array<i32>} : memref<1x1x128xf32, #tpu.memory_space<vmem>>, vector<1x1x128xf32>,
    } else {
    }
    return
  }
  func.func @transform_0(%arg0: i32, %arg1: i32, %arg2: i32) -> (i32, i32, i32) {
    %c0_i32 = arith.constant 0 : i32
    %c0_i32_0 = arith.constant 0 : i32
    return %arg0, %c0_i32, %arg2 : i32, i32, i32
  }
  func.func @transform_1(%arg0: i32, %arg1: i32, %arg2: i32) -> (i32, i32) {
    %c0_i32 = arith.constant 0 : i32
    %c0_i32_0 = arith.constant 0 : i32
    %c0_i32_1 = arith.constant 0 : i32
    return %c0_i32, %c0_i32_0 : i32, i32
  }
  func.func @transform_2(%arg0: i32, %arg1: i32, %arg2: i32) -> (i32, i32) {
    %c0_i32 = arith.constant 0 : i32
    %c0_i32_0 = arith.constant 0 : i32
    return %arg1, %c0_i32 : i32, i32
  }
  func.func @transform_3(%arg0: i32, %arg1: i32, %arg2: i32) -> (i32, i32) {
    %c0_i32 = arith.constant 0 : i32
    %c0_i32_0 = arith.constant 0 : i32
    return %arg1, %c0_i32 : i32, i32
  }
  func.func @transform_4(%arg0: i32, %arg1: i32, %arg2: i32) -> (i32, i32, i32) {
    %c0_i32 = arith.constant 0 : i32
    %c0_i32_0 = arith.constant 0 : i32
    return %arg0, %c0_i32, %arg1 : i32, i32, i32
  }
}

module attributes {stable_mosaic.version = 11 : i64} {
  func.func @_incv3_feature_kernel(%arg0: i32, %arg1: i32, %arg2: i32, %arg3: memref<1x5x256xbf16, #tpu.memory_space<vmem>>, %arg4: memref<128x5xbf16, #tpu.memory_space<vmem>>, %arg5: memref<128x128xbf16, #tpu.memory_space<vmem>>, %arg6: memref<128x1xf32, #tpu.memory_space<vmem>>, %arg7: memref<1x1x128xf32, #tpu.memory_space<vmem>>, %arg8: memref<128x128xf32, #tpu.memory_space<vmem>>) attributes {dimension_semantics = [#tpu.dimension_semantics<parallel>, #tpu.dimension_semantics<parallel>, #tpu.dimension_semantics<arbitrary>], iteration_bounds = array<i64: 2, 1, 1>, scalar_prefetch = 0 : i64, scratch_operands = 1 : i64, tpu.core_type = #tpu.core_type<tc>, window_params = [{transform_indices = @transform_0, window_bounds = array<i64: 1, 5, 256>}, {pipeline_mode = #tpu.pipeline_mode<synchronous>, transform_indices = @transform_1, window_bounds = array<i64: 128, 5>}, {transform_indices = @transform_2, window_bounds = array<i64: 128, 128>}, {transform_indices = @transform_3, window_bounds = array<i64: 128, 1>}, {transform_indices = @transform_4, window_bounds = array<i64: 1, 1, 128>}]} {
    %c0_i32 = arith.constant 0 : i32
    %0 = arith.cmpi eq, %arg2, %c0_i32 : i32
    %1 = arith.extui %0 : i1 to i32
    %c0_i32_0 = arith.constant 0 : i32
    %2 = arith.cmpi ne, %1, %c0_i32_0 : i32
    scf.if %2 {
      %cst_18 = arith.constant 0.000000e+00 : f32
      %26 = vector.broadcast %cst_18 : f32 to vector<128x128xf32>
      %c0_19 = arith.constant 0 : index
      %c0_20 = arith.constant 0 : index
      %27 = vector.load %arg8[%c0_19, %c0_20] : memref<128x128xf32, #tpu.memory_space<vmem>>, vector<128x128xf32>
      tpu.vector_store %arg8[%c0_19, %c0_20], %26 {strides = array<i32>} : memref<128x128xf32, #tpu.memory_space<vmem>>, vector<128x128xf32>,
    } else {
    }
    %c0 = arith.constant 0 : index
    %c0_1 = arith.constant 0 : index
    %c0_2 = arith.constant 0 : index
    %3 = vector.load %arg3[%c0, %c0_1, %c0_2] : memref<1x5x256xbf16, #tpu.memory_space<vmem>>, vector<1x5x256xbf16>
    %4 = vector.shape_cast %3 : vector<1x5x256xbf16> to vector<5x256xbf16>
    %c0_3 = arith.constant 0 : index
    %c0_4 = arith.constant 0 : index
    %5 = vector.load %arg4[%c0_3, %c0_4] : memref<128x5xbf16, #tpu.memory_space<vmem>>, vector<128x5xbf16>
    %cst = arith.constant dense<0.000000e+00> : vector<128x256xf32>
    %6 = tpu.matmul %5, %4, %cst {dimension_numbers = #tpu.dot_dimension_numbers<[1], [0], [0], [1], [0, 0, 1, 1], [], []>} : vector<128x5xbf16>, vector<5x256xbf16>, vector<128x256xf32> -> vector<128x256xf32>
    %cst_5 = arith.constant 0.000000e+00 : f32
    %7 = vector.broadcast %cst_5 : f32 to vector<128x256xf32>
    %8 = arith.maximumf %6, %7 : vector<128x256xf32>
    %c0_6 = arith.constant 0 : index
    %c0_7 = arith.constant 0 : index
    %9 = vector.load %arg5[%c0_6, %c0_7] : memref<128x128xbf16, #tpu.memory_space<vmem>>, vector<128x128xbf16>
    %10 = arith.truncf %8 : vector<128x256xf32> to vector<128x256xbf16>
    %cst_8 = arith.constant dense<0.000000e+00> : vector<128x256xf32>
    %11 = tpu.matmul %9, %10, %cst_8 {dimension_numbers = #tpu.dot_dimension_numbers<[1], [0], [0], [1], [0, 0, 1, 1], [], []>} : vector<128x128xbf16>, vector<128x256xbf16>, vector<128x256xf32> -> vector<128x256xf32>
    %c0_9 = arith.constant 0 : index
    %c0_10 = arith.constant 0 : index
    %12 = vector.load %arg6[%c0_9, %c0_10] : memref<128x1xf32, #tpu.memory_space<vmem>>, vector<128x1xf32>
    %13 = vector.broadcast %12 : vector<128x1xf32> to vector<128x256xf32>
    %14 = arith.addf %11, %13 : vector<128x256xf32>
    %cst_11 = arith.constant 0.000000e+00 : f32
    %15 = vector.broadcast %cst_11 : f32 to vector<128x256xf32>
    %16 = arith.maximumf %14, %15 : vector<128x256xf32>
    %17 = vector.extract_strided_slice %16 {offsets = [0, 0], sizes = [128, 128], strides = [1, 1]} : vector<128x256xf32> to vector<128x128xf32>
    %18 = vector.extract_strided_slice %16 {offsets = [0, 128], sizes = [128, 128], strides = [1, 1]} : vector<128x256xf32> to vector<128x128xf32>
    %19 = arith.addf %17, %18 : vector<128x128xf32>
    %c0_12 = arith.constant 0 : index
    %c0_13 = arith.constant 0 : index
    %20 = vector.load %arg8[%c0_12, %c0_13] : memref<128x128xf32, #tpu.memory_space<vmem>>, vector<128x128xf32>
    %21 = arith.addf %20, %19 : vector<128x128xf32>
    %c0_14 = arith.constant 0 : index
    %c0_15 = arith.constant 0 : index
    %22 = vector.load %arg8[%c0_14, %c0_15] : memref<128x128xf32, #tpu.memory_space<vmem>>, vector<128x128xf32>
    tpu.vector_store %arg8[%c0_14, %c0_15], %21 {strides = array<i32>} : memref<128x128xf32, #tpu.memory_space<vmem>>, vector<128x128xf32>,
    %c0_i32_16 = arith.constant 0 : i32
    %23 = arith.cmpi eq, %arg2, %c0_i32_16 : i32
    %24 = arith.extui %23 : i1 to i32
    %c0_i32_17 = arith.constant 0 : i32
    %25 = arith.cmpi ne, %24, %c0_i32_17 : i32
    scf.if %25 {
      %c0_18 = arith.constant 0 : index
      %c0_19 = arith.constant 0 : index
      %26 = vector.load %arg8[%c0_18, %c0_19] : memref<128x128xf32, #tpu.memory_space<vmem>>, vector<128x128xf32>
      %27 = tpu.transpose %26, [1, 0] : vector<128x128xf32> -> vector<128x128xf32>
      %cst_20 = arith.constant dense<0.000000e+00> : vector<128xf32>
      %28 = vector.multi_reduction <add>, %27, %cst_20 [0] : vector<128x128xf32> to vector<128xf32>
      %29 = vector.shape_cast %28 : vector<128xf32> to vector<1x128xf32>
      %cst_21 = arith.constant 3.906250e-03 : f32
      %30 = vector.broadcast %cst_21 : f32 to vector<1x128xf32>
      %31 = arith.mulf %29, %30 : vector<1x128xf32>
      %c0_22 = arith.constant 0 : index
      %c0_23 = arith.constant 0 : index
      %c0_24 = arith.constant 0 : index
      %32 = vector.load %arg7[%c0_22, %c0_23, %c0_24] : memref<1x1x128xf32, #tpu.memory_space<vmem>>, vector<1x1x128xf32>
      %33 = vector.shape_cast %32 : vector<1x1x128xf32> to vector<1x128xf32>
      %34 = vector.shape_cast %31 : vector<1x128xf32> to vector<1x1x128xf32>
      tpu.vector_store %arg7[%c0_22, %c0_23, %c0_24], %34 {strides = array<i32>} : memref<1x1x128xf32, #tpu.memory_space<vmem>>, vector<1x1x128xf32>,
    } else {
    }
    return
  }
  func.func @transform_0(%arg0: i32, %arg1: i32, %arg2: i32) -> (i32, i32, i32) {
    %c0_i32 = arith.constant 0 : i32
    %c0_i32_0 = arith.constant 0 : i32
    return %arg0, %c0_i32, %arg2 : i32, i32, i32
  }
  func.func @transform_1(%arg0: i32, %arg1: i32, %arg2: i32) -> (i32, i32) {
    %c0_i32 = arith.constant 0 : i32
    %c0_i32_0 = arith.constant 0 : i32
    %c0_i32_1 = arith.constant 0 : i32
    return %c0_i32, %c0_i32_0 : i32, i32
  }
  func.func @transform_2(%arg0: i32, %arg1: i32, %arg2: i32) -> (i32, i32) {
    %c0_i32 = arith.constant 0 : i32
    %c0_i32_0 = arith.constant 0 : i32
    return %arg1, %c0_i32 : i32, i32
  }
  func.func @transform_3(%arg0: i32, %arg1: i32, %arg2: i32) -> (i32, i32) {
    %c0_i32 = arith.constant 0 : i32
    %c0_i32_0 = arith.constant 0 : i32
    return %arg1, %c0_i32 : i32, i32
  }
  func.func @transform_4(%arg0: i32, %arg1: i32, %arg2: i32) -> (i32, i32, i32) {
    %c0_i32 = arith.constant 0 : i32
    %c0_i32_0 = arith.constant 0 : i32
    return %arg0, %c0_i32, %arg1 : i32, i32, i32
  }
}

</mosaic_0001>

<bundles_post_ra>
// kernel: tpu_custom_call.1
= control target key start
LH: loop header
LB: loop body
LE: loop exit
PB: predicated region body
PF: predicated region fallthrough
CT: control target
= control target key end

     0   :  { %9 = vsyncpa [#allocation4], 0  ;;  %s1589_s0 = inlined_call_operand.vmem [shape: bf16[2,5,256], index: 0, kind: input, shape index: {}]   ;;  %s1590_s1 = inlined_call_operand.vmem [shape: bf16[128,5], index: 1, kind: input, shape index: {}]   ;;  %s1591_s2 = inlined_call_operand.vmem [shape: bf16[128,128], index: 2, kind: input, shape index: {}]   ;;  %s1592_s3 = inlined_call_operand.vmem [shape: f32[128,1], index: 3, kind: input, shape index: {}]   ;;  %s1593_s4 = inlined_call_operand.hbm [shape: f32[2,1,128], index: 4, kind: output, shape index: {}]  }
   0x1   :  { %11 = vsyncpa [#allocation4 + $0x1], 0  ;;  %s1355_s15 = smov 0   ;;  %s1357_s16 = smov 0  }
   0x2   :  { %s1359_s17 = smov 0   ;;  %s1361_s18 = smov 0  }
   0x3   :  { %s1363_s19 = smov 0   ;;  %s1365_s20 = smov 0  }
   0x4 LB: > { %s1115_s21 = sadd.s32 4294967295, %s1325_s20   ;;  %s1116_s22 = sadd.s32 4294967294, %s1325_s20   ;;  %s1325_s20 = sphi %s1365_s20, %s17_s20   ;;  %s1321_s19 = sphi %s1363_s19, %s1600_s19   ;;  %s1317_s18 = sphi %s1361_s18, %s1599_s18   ;;  %s1313_s17 = sphi %s1359_s17, %s1598_s17   ;;  %s1309_s16 = sphi %s1357_s16, %s1597_s16   ;;  %s1305_s15 = sphi %s1355_s15, %s1596_s15  }
   0x5   : > { %s36_s23 = sadd.s32 1, %s1321_s19  ;;  %s146_s24 = sadd.s32 1, %s1313_s17 }
   0x6   : > { %p38_p0 = scmp.ge.s32.totalorder %s36_s23, 2  ;;  %p156_p1 = scmp.ne.s32.totalorder %s1313_s17, %s1309_s16 }
   0x7   : > { %p157_p2 = scmp.eq.s32.totalorder %s1115_s21, 1  ;;  %p162_p3 = scmp.ne.s32.totalorder %s1309_s16, %s1305_s15 }
   0x8   : > { %s1602_s23 = smov (%p38_p0, %s36_s23), 0  ;;  %p163_p5 = scmp.eq.s32.totalorder %s1116_s22, 1 }
   0x9   : > { %p1395_p4 = por %p157_p2, %p156_p1  ;;  %s141_s26 = ssub.s32 %s1321_s19, %s1602_s23 }
   0xa   : > { %p1121_p6 = scmp.ge.s32.totalorder %s1325_s20, 1  ;;  %p144_p7 = scmp.eq.s32.totalorder %s141_s26, 0 }
   0xb   : > { %p1402_p8 = por %p163_p5, %p162_p3  ;;  %p215_p9 = scmp.lt.s32.totalorder %s1325_s20, 3 }
   0xc   : > { %s1408_s28 = scalar_select %p144_p7, %s1313_s17, %s146_s24  }
   0xd   : > { %p216_p10 = pnand %p1121_p6, %p215_p9 }
   0xe   : > { %p255_p11 = scmp.lt.s32.totalorder (!%p216_p10), %s1317_s18, 1  ;;  %vm384_vm0 = vcmask (!%p216_p10), 1041408   ;;  %v1327_v0 = vmov (!%p216_p10), 0   ;;  %vm385_vm1 = vcmask (!%p216_p10), 1042432   ;;  %v1328_v1 = vmov (!%p216_p10), 65535   ;;  %v1231_v9 = vld [vmem:[%s1590_s1] sm:$0xff] (!%p216_p10)  }
   0xf   : > { %219 = sbr.rel (%p216_p10) target bundleno = 752 (0x2f0), region = 36  ;;  %426 = vmatprep.mubr.bf16.mxu0 (!%p216_p10), %v1327_v0  ;;  %757 = vmatprep.mubr.bf16.mxu1 (!%p216_p10), %v1327_v0  ;;  %v386_v2 = vsel (!%p216_p10), %vm384_vm0, 4294967295, %v1328_v1  ;;  %vm359_vm2 = vcmask (!%p216_p10), 39936   ;;  %v1232_v10 = vld [vmem:[%s1590_s1 + $0x8] sm:$0xff] (!%p216_p10)   ;;  %v1233_v11 = vld [vmem:[%s1590_s1 + $0x10] sm:$0xff] (!%p216_p10)   ;;  %v1234_v12 = vld [vmem:[%s1590_s1 + $0x18] sm:$0xff] (!%p216_p10)  }
  0x10   : > { %1227 = vset.pattern.permute.xlu0 (!%p216_p10), %v1327_v0  ;;  %1228 = vset.pattern.permute.xlu1 (!%p216_p10), %v1327_v0  ;;  %v387_v4 = vsel (!%p216_p10), %vm385_vm1, %v386_v2, 0  ;;  %v1235_v13 = vld [vmem:[%s1590_s1 + $0x20] sm:$0xff] (!%p216_p10)   ;;  %v1236_v14 = vld [vmem:[%s1590_s1 + $0x28] sm:$0xff] (!%p216_p10)   ;;  %v1237_v15 = vld [vmem:[%s1590_s1 + $0x30] sm:$0xff] (!%p216_p10)   ;;  %s252_s8 = sand.u32 (!%p216_p10), 1, %s1309_s16   ;;  %s1150_s9 = sshll.u32 (!%p216_p10), %s1317_s18, 4 }
  0x11   : > { %v1238_v16 = vld [vmem:[%s1590_s1 + $0x38] sm:$0xff] (!%p216_p10)   ;;  %v571_v17 = vld [vmem:[%s1592_s3] sm:$0xff] (!%p216_p10)  ;;  %v573_v18 = vld [vmem:[%s1592_s3 + $0x10] sm:$0xff] (!%p216_p10)  ;;  %s253_s10 = scalar_lea.vmem (!%p216_p10), [#allocation3], %s252_s8  ;;  %s1542_s14 = scalar_lea.hbm (!%p216_p10), %s1593_s4, %s1150_s9 }
  0x12   : > { %589 = vperm.xlu0 (!%p216_p10), %1227, %v571_v17   ;;  %599 = vperm.xlu1 (!%p216_p10), %1228, %v573_v18   ;;  %v572_v19 = vld [vmem:[%s1592_s3 + $0x8] sm:$0xff] (!%p216_p10)  ;;  %v574_v20 = vld [vmem:[%s1592_s3 + $0x18] sm:$0xff] (!%p216_p10)  ;;  %v575_v21 = vld [vmem:[%s1592_s3 + $0x20] sm:$0xff] (!%p216_p10)  ;;  %s1012_s11 = sshll.u32 (!%p216_p10), %s253_s10, 4  ;;  %s999_s21 = scalar_lea.sflag (!%p216_p10), [#allocation4], %s252_s8  ;;  %s1544_s11 = int_to_ptr.vmem [resolvable:$true] %s1012_s11 }
  0x13   : > { %v576_v22 = vld [vmem:[%s1592_s3 + $0x28] sm:$0xff] (!%p216_p10)  ;;  %v577_v23 = vld [vmem:[%s1592_s3 + $0x30] sm:$0xff] (!%p216_p10)  ;;  %v578_v24 = vld [vmem:[%s1592_s3 + $0x38] sm:$0xff] (!%p216_p10)  ;;  %s1247_s22 = scalar_lea.vmem (!%p216_p10), %s1544_s11, 16 }
  0x14   : > { %v579_v28 = vld [vmem:[%s1592_s3 + $0x40] sm:$0xff] (!%p216_p10)  ;;  %v580_v29 = vld [vmem:[%s1592_s3 + $0x48] sm:$0xff] (!%p216_p10)  ;;  %v581_v37 = vld [vmem:[%s1592_s3 + $0x50] sm:$0xff] (!%p216_p10)  ;;  %p1248_p12 = scmp.ne.s32.totalorder (!%p216_p10), %s1544_s11, %s1247_s22 }
  0x15   : > { %v582_v38 = vld [vmem:[%s1592_s3 + $0x58] sm:$0xff] (!%p216_p10)  ;;  %v583_v45 = vld [vmem:[%s1592_s3 + $0x60] sm:$0xff] (!%p216_p10)  ;;  %v584_v46 = vld [vmem:[%s1592_s3 + $0x68] sm:$0xff] (!%p216_p10) }
  0x16   : > { %s256_s29 = scalar_select %p255_p11, %s1317_s18, 1  ;;  %594 = vperm.xlu0 %1227, %v572_v19   ;;  %604 = vperm.xlu1 %1228, %v574_v20   ;;  %v585_v51 = vld [vmem:[%s1592_s3 + $0x70] sm:$0xff]  ;;  %v586_v52 = vld [vmem:[%s1592_s3 + $0x78] sm:$0xff] }
  0x17   : > { %p1249_p13 = pnand %p1248_p12, %p1395_p4  ;;  %s1329_s18 = smov [#allocation3]  }
  0x18   : > { %s1153_s30 = sshll.u32 %s256_s29, 3  ;;  %s1251_s24 = sshll.u32 %s1329_s18, 4  ;;  %s1252_s24 = int_to_ptr.vmem [resolvable:$false] %s1251_s24 }
  0x19   : > { %s262_s7 = scalar_lea.vmem %s1589_s0, %s1153_s30  ;;  %p1250_p0 = pneg %p1249_p13 }
  0x1a   : > { %v297_v3 = vld [vmem:[%s262_s7] sm:$0x77]  ;;  %609 = vperm.xlu0 %1227, %v575_v21   ;;  %614 = vperm.xlu1 %1228, %v576_v22   ;;  %s1253_s26 = scalar_lea.vmem %s1252_s24, 32  ;;  %p1254_p1 = scmp.lt.s32.totalorder %s1544_s11, %s1252_s24 }
  0x1b   : > { %v1133_v5 = vcombine.high %v297_v3, %v297_v3  ;;  %v1132_v6 = vcombine.low %v297_v3, %v297_v3  ;;  %p1255_p2 = scmp.lt.s32.totalorder %s1253_s26, %s1247_s22 }
  0x1d   : > { %v392_v7 = vand.u32 %v1133_v5, %v387_v4  ;;  %v389_v8 = vand.u32 %v1132_v6, %v387_v4  ;;  %p1256_p3 = por %p1255_p2, %p1254_p1 }
  0x1e   : > { %619 = vperm.xlu0 %1227, %v577_v23   ;;  %624 = vperm.xlu1 %1228, %v578_v24  }
  0x1f   : > { %394 = vmatprep.subr.bf16.mxu0 %v392_v7  ;;  %p1257_p5 = pnand %p1256_p3, %p1250_p0 }
  0x20   : > { %395 = vmatpush1.bf16.msra.mxu0 %v389_v8 }
  0x22   : > { %629 = vperm.xlu0 %1227, %v579_v28   ;;  %634 = vperm.xlu1 %1228, %v580_v29  }
  0x23   : > { %1134 = vmatmul.mubr.msk.bf16.vlgmr.msra.gmra.mrb[0].mxu0 %vm359_vm2, %v1231_v9 }
  0x24   : > { %436 = vmatprep.mubr.bf16.mxu0 %v1327_v0 }
  0x26   : > { %639 = vperm.xlu0 %1227, %v581_v37   ;;  %644 = vperm.xlu1 %1228, %v582_v38  }
  0x2a   : > { %649 = vperm.xlu0 %1227, %v583_v45   ;;  %654 = vperm.xlu1 %1228, %v584_v46  }
  0x2b   : > { %1135 = vmatmul.mubr.msk.bf16.gmra.mrb[4].mxu0 %vm359_vm2, %v1232_v10 }
  0x2c   : > { %446 = vmatprep.mubr.bf16.mxu0 %v1327_v0 }
  0x2e   : > { %659 = vperm.xlu0 %1227, %v585_v51   ;;  %664 = vperm.xlu1 %1228, %v586_v52   ;;  %v1240_v51 = vld [vmem:[%s1591_s2 + $0x8] sm:$0xff]   ;;  %v1241_v52 = vld [vmem:[%s1591_s2 + $0x10] sm:$0xff]  }
  0x33   : > { %1136 = vmatmul.mubr.msk.bf16.gmra.mrb[8].mxu0 %vm359_vm2, %v1233_v11 }
  0x34   : > { %456 = vmatprep.mubr.bf16.mxu0 %v1327_v0 }
  0x3b   : > { %1137 = vmatmul.mubr.msk.bf16.gmra.mrb[12].mxu0 %vm359_vm2, %v1234_v12 }
  0x3c   : > { %466 = vmatprep.mubr.bf16.mxu0 %v1327_v0 }
  0x43   : > { %1138 = vmatmul.mubr.msk.bf16.gmra.mrb[16].mxu0 %vm359_vm2, %v1235_v13 }
  0x44   : > { %476 = vmatprep.mubr.bf16.mxu0 %v1327_v0 }
  0x4b   : > { %1139 = vmatmul.mubr.msk.bf16.gmra.mrb[20].mxu0 %vm359_vm2, %v1236_v14 }
  0x4c   : > { %486 = vmatprep.mubr.bf16.mxu0 %v1327_v0 }
  0x53   : > { %1140 = vmatmul.mubr.msk.bf16.gmra.mrb[24].mxu0 %vm359_vm2, %v1237_v15 }
  0x54   : > { %496 = vmatprep.mubr.bf16.mxu0 %v1327_v0 }
  0x5b   : > { %1141 = vmatmul.mubr.msk.bf16.gmra.mrb[28].mxu0 %vm359_vm2, %v1238_v16 }
  0x5c   : > { %747 = vmatprep.mubr.bf16.mxu0 %v1327_v0 }
  0xf6   : > { %v428_v25 = vpop.f32.mrb[0].mxu0 }
  0xf7   : > { %v430_v26 = vpop.f32.mrb[1].mxu0  ;;  %v507_v30 = vmax.f32 %v428_v25, 0.0 }
  0xf8   : > { %v432_v27 = vpop.f32.mrb[2].mxu0  ;;  %v508_v33 = vmax.f32 %v430_v26, 0.0 }
  0xf9   : > { %v509_v31 = vmax.f32 %v432_v27, 0.0  ;;  %v434_v32 = vpop.f32.mrb[3].mxu0 }
  0xfa   : > { %v510_v34 = vmax.f32 %v434_v32, 0.0 }
  0xfb   : > { %v555_v35 = vpack.c.bf16 %v509_v31, %v507_v30 }
  0xfc   : > { %v556_v36 = vpack.c.bf16 %v510_v34, %v508_v33 }
  0xfe   : > { %v438_v39 = vpop.f32.mrb[4].mxu0  ;;  %715 = vmatprep.subr.bf16.mxu0 %v556_v36  ;;  %1154 = vmatprep.subr.bf16.mxu1 %v556_v36 }
  0xff   : > { %v440_v40 = vpop.f32.mrb[5].mxu0  ;;  %716 = vmatpush1.bf16.msra.mxu0 %v555_v35  ;;  %1162 = vmatpush1.bf16.msra.mxu1 %v555_v35  ;;  %v511_v42 = vmax.f32 %v438_v39, 0.0 }
 0x100   : > { %v442_v41 = vpop.f32.mrb[6].mxu0  ;;  %v512_v47 = vmax.f32 %v440_v40, 0.0 }
 0x101   : > { %v513_v43 = vmax.f32 %v442_v41, 0.0  ;;  %v444_v44 = vpop.f32.mrb[7].mxu0 }
 0x102   : > { %v514_v48 = vmax.f32 %v444_v44, 0.0 }
 0x103   : > { %v557_v49 = vpack.c.bf16 %v513_v43, %v511_v42 }
 0x104   : > { %v558_v50 = vpack.c.bf16 %v514_v48, %v512_v47 }
 0x106   : > { %v448_v53 = vpop.f32.mrb[8].mxu0  ;;  %717 = vmatprep.subr.bf16.mxu0 %v558_v50  ;;  %1155 = vmatprep.subr.bf16.mxu1 %v558_v50  ;;  %v1239_v50 = vld [vmem:[%s1591_s2] sm:$0xff]  }
 0x107   : > { %v450_v54 = vpop.f32.mrb[9].mxu0  ;;  %718 = vmatpush1.bf16.msra.mxu0 %v557_v49  ;;  %1163 = vmatpush1.bf16.msra.mxu1 %v557_v49  ;;  %v515_v56 = vmax.f32 %v448_v53, 0.0  ;;  %v1242_v53 = vld [vmem:[%s1591_s2 + $0x18] sm:$0xff]  }
 0x108   : > { %v452_v55 = vpop.f32.mrb[10].mxu0  ;;  %v516_v59 = vmax.f32 %v450_v54, 0.0  ;;  %v1243_v54 = vld [vmem:[%s1591_s2 + $0x20] sm:$0xff]  }
 0x109   : > { %v517_v57 = vmax.f32 %v452_v55, 0.0  ;;  %v454_v58 = vpop.f32.mrb[11].mxu0  ;;  %v1244_v55 = vld [vmem:[%s1591_s2 + $0x28] sm:$0xff]  }
 0x10a   : > { %v518_v60 = vmax.f32 %v454_v58, 0.0  ;;  %v590_v58 = vpop.permute.xlu0 %589 }
 0x10b   : > { %v559_v61 = vpack.c.bf16 %v517_v57, %v515_v56  ;;  %v1245_v56 = vld [vmem:[%s1591_s2 + $0x30] sm:$0xff]   ;;  %v1246_v57 = vld [vmem:[%s1591_s2 + $0x38] sm:$0xff]  }
 0x10c   : > { %v560_v62 = vpack.c.bf16 %v518_v60, %v516_v59  ;;  %v600_v59 = vpop.permute.xlu1 %599 }
 0x10e   : > { %v458_v63 = vpop.f32.mrb[12].mxu0  ;;  %719 = vmatprep.subr.bf16.mxu0 %v560_v62  ;;  %1156 = vmatprep.subr.bf16.mxu1 %v560_v62  ;;  %v595_v60 = vpop.permute.xlu0 %594 }
 0x10f   : > { %v460_v1 = vpop.f32.mrb[13].mxu0  ;;  %720 = vmatpush1.bf16.msra.mxu0 %v559_v61  ;;  %1164 = vmatpush1.bf16.msra.mxu1 %v559_v61  ;;  %v519_v3 = vmax.f32 %v458_v63, 0.0 }
 0x110   : > { %v462_v2 = vpop.f32.mrb[14].mxu0  ;;  %v520_v6 = vmax.f32 %v460_v1, 0.0  ;;  %v605_v61 = vpop.permute.xlu1 %604 }
 0x111   : > { %v521_v4 = vmax.f32 %v462_v2, 0.0  ;;  %v464_v5 = vpop.f32.mrb[15].mxu0 }
 0x112   : > { %v522_v7 = vmax.f32 %v464_v5, 0.0 }
 0x113   : > { %v561_v8 = vpack.c.bf16 %v521_v4, %v519_v3 }
 0x114   : > { %v562_v9 = vpack.c.bf16 %v522_v7, %v520_v6 }
 0x116   : > { %v468_v10 = vpop.f32.mrb[16].mxu0  ;;  %721 = vmatprep.subr.bf16.mxu0 %v562_v9  ;;  %1157 = vmatprep.subr.bf16.mxu1 %v562_v9 }
 0x117   : > { %v470_v11 = vpop.f32.mrb[17].mxu0  ;;  %722 = vmatpush1.bf16.msra.mxu0 %v561_v8  ;;  %1165 = vmatpush1.bf16.msra.mxu1 %v561_v8  ;;  %v523_v13 = vmax.f32 %v468_v10, 0.0 }
 0x118   : > { %v472_v12 = vpop.f32.mrb[18].mxu0  ;;  %v524_v16 = vmax.f32 %v470_v11, 0.0 }
 0x119   : > { %v525_v14 = vmax.f32 %v472_v12, 0.0  ;;  %v474_v15 = vpop.f32.mrb[19].mxu0 }
 0x11a   : > { %v526_v17 = vmax.f32 %v474_v15, 0.0 }
 0x11b   : > { %v563_v18 = vpack.c.bf16 %v525_v14, %v523_v13 }
 0x11c   : > { %v564_v19 = vpack.c.bf16 %v526_v17, %v524_v16 }
 0x11e   : > { %v478_v20 = vpop.f32.mrb[20].mxu0  ;;  %723 = vmatprep.subr.bf16.mxu0 %v564_v19  ;;  %1158 = vmatprep.subr.bf16.mxu1 %v564_v19 }
 0x11f   : > { %v480_v21 = vpop.f32.mrb[21].mxu0  ;;  %724 = vmatpush1.bf16.msra.mxu0 %v563_v18  ;;  %1166 = vmatpush1.bf16.msra.mxu1 %v563_v18  ;;  %v527_v23 = vmax.f32 %v478_v20, 0.0 }
 0x120   : > { %v482_v22 = vpop.f32.mrb[22].mxu0  ;;  %v528_v26 = vmax.f32 %v480_v21, 0.0 }
 0x121   : > { %v529_v24 = vmax.f32 %v482_v22, 0.0  ;;  %v484_v25 = vpop.f32.mrb[23].mxu0 }
 0x122   : > { %v530_v27 = vmax.f32 %v484_v25, 0.0 }
 0x123   : > { %v565_v28 = vpack.c.bf16 %v529_v24, %v527_v23  ;;  %v610_v24 = vpop.permute.xlu0 %609 }
 0x124   : > { %v566_v29 = vpack.c.bf16 %v530_v27, %v528_v26 }
 0x126   : > { %v488_v30 = vpop.f32.mrb[24].mxu0  ;;  %725 = vmatprep.subr.bf16.mxu0 %v566_v29  ;;  %1159 = vmatprep.subr.bf16.mxu1 %v566_v29 }
 0x127   : > { %v490_v31 = vpop.f32.mrb[25].mxu0  ;;  %726 = vmatpush1.bf16.msra.mxu0 %v565_v28  ;;  %1167 = vmatpush1.bf16.msra.mxu1 %v565_v28  ;;  %v531_v33 = vmax.f32 %v488_v30, 0.0  ;;  %v615_v30 = vpop.permute.xlu1 %614 }
 0x128   : > { %v492_v32 = vpop.f32.mrb[26].mxu0  ;;  %v532_v36 = vmax.f32 %v490_v31, 0.0 }
 0x129   : > { %v533_v34 = vmax.f32 %v492_v32, 0.0  ;;  %v494_v35 = vpop.f32.mrb[27].mxu0 }
 0x12a   : > { %v534_v37 = vmax.f32 %v494_v35, 0.0 }
 0x12b   : > { %v567_v38 = vpack.c.bf16 %v533_v34, %v531_v33 }
 0x12c   : > { %v568_v39 = vpack.c.bf16 %v534_v37, %v532_v36 }
 0x12e   : > { %v498_v40 = vpop.f32.mrb[28].mxu0  ;;  %727 = vmatprep.subr.bf16.mxu0 %v568_v39  ;;  %1160 = vmatprep.subr.bf16.mxu1 %v568_v39 }
 0x12f   : > { %v500_v41 = vpop.f32.mrb[29].mxu0  ;;  %728 = vmatpush1.bf16.msra.mxu0 %v567_v38  ;;  %1168 = vmatpush1.bf16.msra.mxu1 %v567_v38  ;;  %v535_v43 = vmax.f32 %v498_v40, 0.0 }
 0x130   : > { %v502_v42 = vpop.f32.mrb[30].mxu0  ;;  %v536_v46 = vmax.f32 %v500_v41, 0.0  ;;  %v620_v41 = vpop.permute.xlu0 %619 }
 0x131   : > { %v537_v44 = vmax.f32 %v502_v42, 0.0  ;;  %v504_v45 = vpop.f32.mrb[31].mxu0 }
 0x132   : > { %v538_v47 = vmax.f32 %v504_v45, 0.0 }
 0x133   : > { %v569_v48 = vpack.c.bf16 %v537_v44, %v535_v43 }
 0x134   : > { %v570_v49 = vpack.c.bf16 %v538_v47, %v536_v46  ;;  %v625_v46 = vpop.permute.xlu1 %624 }
 0x136   : > { %729 = vmatprep.subr.bf16.mxu0 %v570_v49  ;;  %1161 = vmatprep.subr.bf16.mxu1 %v570_v49 }
 0x137   : > { %730 = vmatpush1.bf16.msra.mxu0 %v569_v48  ;;  %1169 = vmatpush1.bf16.msra.mxu1 %v569_v48 }
 0x13a   : > { %748 = vmatmul.mubr.bf16.vlgmr.msra.gmra.mrb[32].mxu0 %v1239_v50  ;;  %758 = vmatmul.mubr.bf16.vlgmr.msra.gmra.mrb[0].mxu1 %v1240_v51 }
 0x13b   : > { %767 = vmatprep.mubr.bf16.mxu1 %v1327_v0 }
 0x142   : > { %768 = vmatmul.mubr.bf16.gmra.mrb[4].mxu1 %v1241_v52 }
 0x143   : > { %777 = vmatprep.mubr.bf16.mxu1 %v1327_v0 }
 0x14a   : > { %778 = vmatmul.mubr.bf16.gmra.mrb[8].mxu1 %v1242_v53 }
 0x14b   : > { %787 = vmatprep.mubr.bf16.mxu1 %v1327_v0 }
 0x152   : > { %788 = vmatmul.mubr.bf16.gmra.mrb[12].mxu1 %v1243_v54 }
 0x153   : > { %797 = vmatprep.mubr.bf16.mxu1 %v1327_v0 }
 0x15a   : > { %798 = vmatmul.mubr.bf16.gmra.mrb[16].mxu1 %v1244_v55 }
 0x15b   : > { %807 = vmatprep.mubr.bf16.mxu1 %v1327_v0 }
 0x162   : > { %808 = vmatmul.mubr.bf16.gmra.mrb[20].mxu1 %v1245_v56 }
 0x163   : > { %817 = vmatprep.mubr.bf16.mxu1 %v1327_v0 }
 0x16a   : > { %818 = vmatmul.mubr.bf16.gmra.mrb[24].mxu1 %v1246_v57  ;;  %v630_v57 = vpop.permute.xlu0 %629 }
 0x20d   : > { %v749_v62 = vpop.f32.mrb[32].mxu0  ;;  %v759_v63 = vpop.f32.mrb[0].mxu1 }
 0x20e   : > { %v750_v1 = vadd.f32 %v749_v62, %v590_v58  ;;  %v751_v2 = vpop.f32.mrb[33].mxu0  ;;  %v760_v3 = vadd.f32 %v759_v63, %v600_v59  ;;  %v761_v4 = vpop.f32.mrb[1].mxu1 }
 0x20f   : > { %v752_v5 = vadd.f32 %v751_v2, %v590_v58  ;;  %v753_v6 = vpop.f32.mrb[34].mxu0  ;;  %v762_v7 = vadd.f32 %v761_v4, %v600_v59  ;;  %v763_v8 = vpop.f32.mrb[2].mxu1 }
 0x210   : > { %v828_v0 = vmax.f32 %v750_v1, 0.0  ;;  %v754_v9 = vadd.f32 %v753_v6, %v595_v60  ;;  %v832_v10 = vmax.f32 %v760_v3, 0.0  ;;  %v755_v11 = vpop.f32.mrb[35].mxu0  ;;  %v764_v12 = vadd.f32 %v763_v8, %v605_v61  ;;  %v765_v13 = vpop.f32.mrb[3].mxu1 }
 0x211   : > { %v829_v14 = vmax.f32 %v752_v5, 0.0  ;;  %v756_v15 = vadd.f32 %v755_v11, %v595_v60  ;;  %v833_v16 = vmax.f32 %v762_v7, 0.0  ;;  %v766_v17 = vadd.f32 %v765_v13, %v605_v61  ;;  %v635_v62 = vpop.permute.xlu1 %634 }
 0x212   : > { %v830_v18 = vmax.f32 %v754_v9, 0.0  ;;  %v834_v19 = vmax.f32 %v764_v12, 0.0  ;;  %v640_v9 = vpop.permute.xlu0 %639 }
 0x213   : > { %v860_v20 = vadd.f32 %v829_v14, %v828_v0  ;;  %v831_v21 = vmax.f32 %v756_v15, 0.0  ;;  %v862_v22 = vadd.f32 %v833_v16, %v832_v10  ;;  %v835_v23 = vmax.f32 %v766_v17, 0.0 }
 0x215   : > { %v861_v25 = vadd.f32 %v831_v21, %v830_v18  ;;  %v863_v26 = vadd.f32 %v835_v23, %v834_v19  ;;  %v769_v27 = vpop.f32.mrb[4].mxu1  ;;  %943 = vxpose.xlu0.b32.start [1/16] %v860_v20, 128  ;;  %v645_v14 = vpop.permute.xlu1 %644 }
 0x216   : > { %v770_v28 = vadd.f32 %v769_v27, %v610_v24  ;;  %v771_v29 = vpop.f32.mrb[5].mxu1 }
 0x217   : > { %v772_v31 = vadd.f32 %v771_v29, %v610_v24  ;;  %v773_v32 = vpop.f32.mrb[6].mxu1 }
 0x218   : > { %v836_v33 = vmax.f32 %v770_v28, 0.0  ;;  %v774_v34 = vadd.f32 %v773_v32, %v615_v30  ;;  %v775_v35 = vpop.f32.mrb[7].mxu1 }
 0x219   : > { %v837_v36 = vmax.f32 %v772_v31, 0.0  ;;  %944 = vxpose.xlu0.b32.cont [2/16] %v861_v25, 128  ;;  %v776_v37 = vadd.f32 %v775_v35, %v615_v30  ;;  %v650_v25 = vpop.permute.xlu0 %649  ;;  %v655_v30 = vpop.permute.xlu1 %654 }
 0x21a   : > { %v838_v38 = vmax.f32 %v774_v34, 0.0 }
 0x21b   : > { %v864_v39 = vadd.f32 %v837_v36, %v836_v33  ;;  %v839_v40 = vmax.f32 %v776_v37, 0.0 }
 0x21d   : > { %v865_v42 = vadd.f32 %v839_v40, %v838_v38  ;;  %v779_v43 = vpop.f32.mrb[8].mxu1  ;;  %945 = vxpose.xlu0.b32.cont [3/16] %v862_v22, 128 }
 0x21e   : > { %v780_v44 = vadd.f32 %v779_v43, %v620_v41  ;;  %v781_v45 = vpop.f32.mrb[9].mxu1 }
 0x21f   : > { %v782_v47 = vadd.f32 %v781_v45, %v620_v41  ;;  %v783_v48 = vpop.f32.mrb[10].mxu1  ;;  %v660_v41 = vpop.permute.xlu0 %659 }
 0x220   : > { %v840_v49 = vmax.f32 %v780_v44, 0.0  ;;  %v784_v50 = vadd.f32 %v783_v48, %v625_v46  ;;  %v785_v51 = vpop.f32.mrb[11].mxu1 }
 0x221   : > { %v841_v52 = vmax.f32 %v782_v47, 0.0  ;;  %v786_v53 = vadd.f32 %v785_v51, %v625_v46  ;;  %946 = vxpose.xlu0.b32.cont [4/16] %v863_v26, 128  ;;  %v665_v46 = vpop.permute.xlu1 %664 }
 0x222   : > { %v842_v54 = vmax.f32 %v784_v50, 0.0 }
 0x223   : > { %v866_v55 = vadd.f32 %v841_v52, %v840_v49  ;;  %v843_v56 = vmax.f32 %v786_v53, 0.0 }
 0x225   : > { %v867_v58 = vadd.f32 %v843_v56, %v842_v54  ;;  %v789_v59 = vpop.f32.mrb[12].mxu1  ;;  %947 = vxpose.xlu0.b32.cont [5/16] %v864_v39, 128 }
 0x226   : > { %v790_v60 = vadd.f32 %v789_v59, %v630_v57  ;;  %v791_v61 = vpop.f32.mrb[13].mxu1 }
 0x227   : > { %v792_v63 = vadd.f32 %v791_v61, %v630_v57  ;;  %v793_v1 = vpop.f32.mrb[14].mxu1 }
 0x228   : > { %v844_v2 = vmax.f32 %v790_v60, 0.0  ;;  %v794_v3 = vadd.f32 %v793_v1, %v635_v62  ;;  %v795_v4 = vpop.f32.mrb[15].mxu1 }
 0x229   : > { %v845_v5 = vmax.f32 %v792_v63, 0.0  ;;  %v796_v6 = vadd.f32 %v795_v4, %v635_v62  ;;  %948 = vxpose.xlu0.b32.cont [6/16] %v865_v42, 128 }
 0x22a   : > { %v846_v7 = vmax.f32 %v794_v3, 0.0 }
 0x22b   : > { %v868_v8 = vadd.f32 %v845_v5, %v844_v2  ;;  %v847_v0 = vmax.f32 %v796_v6, 0.0 }
 0x22d   : > { %v869_v10 = vadd.f32 %v847_v0, %v846_v7  ;;  %v799_v11 = vpop.f32.mrb[16].mxu1  ;;  %949 = vxpose.xlu0.b32.cont [7/16] %v866_v55, 128 }
 0x22e   : > { %v800_v12 = vadd.f32 %v799_v11, %v640_v9  ;;  %v801_v13 = vpop.f32.mrb[17].mxu1 }
 0x22f   : > { %v802_v15 = vadd.f32 %v801_v13, %v640_v9  ;;  %v803_v16 = vpop.f32.mrb[18].mxu1 }
 0x230   : > { %v848_v17 = vmax.f32 %v800_v12, 0.0  ;;  %v804_v18 = vadd.f32 %v803_v16, %v645_v14  ;;  %v805_v19 = vpop.f32.mrb[19].mxu1 }
 0x231   : > { %v849_v20 = vmax.f32 %v802_v15, 0.0  ;;  %v806_v21 = vadd.f32 %v805_v19, %v645_v14  ;;  %950 = vxpose.xlu0.b32.cont [8/16] %v867_v58, 128 }
 0x232   : > { %v850_v22 = vmax.f32 %v804_v18, 0.0 }
 0x233   : > { %v870_v23 = vadd.f32 %v849_v20, %v848_v17  ;;  %v851_v24 = vmax.f32 %v806_v21, 0.0 }
 0x235   : > { %v871_v26 = vadd.f32 %v851_v24, %v850_v22  ;;  %v809_v27 = vpop.f32.mrb[20].mxu1  ;;  %951 = vxpose.xlu0.b32.cont [9/16] %v868_v8, 128 }
 0x236   : > { %v810_v28 = vadd.f32 %v809_v27, %v650_v25  ;;  %v811_v29 = vpop.f32.mrb[21].mxu1 }
 0x237   : > { %v812_v31 = vadd.f32 %v811_v29, %v650_v25  ;;  %v813_v32 = vpop.f32.mrb[22].mxu1 }
 0x238   : > { %v852_v33 = vmax.f32 %v810_v28, 0.0  ;;  %v814_v34 = vadd.f32 %v813_v32, %v655_v30  ;;  %v815_v35 = vpop.f32.mrb[23].mxu1 }
 0x239   : > { %v853_v36 = vmax.f32 %v812_v31, 0.0  ;;  %v816_v37 = vadd.f32 %v815_v35, %v655_v30  ;;  %952 = vxpose.xlu0.b32.cont [10/16] %v869_v10, 128 }
 0x23a   : > { %v854_v38 = vmax.f32 %v814_v34, 0.0 }
 0x23b   : > { %v872_v39 = vadd.f32 %v853_v36, %v852_v33  ;;  %v855_v40 = vmax.f32 %v816_v37, 0.0 }
 0x23d   : > { %v873_v42 = vadd.f32 %v855_v40, %v854_v38  ;;  %v819_v43 = vpop.f32.mrb[24].mxu1  ;;  %953 = vxpose.xlu0.b32.cont [11/16] %v870_v23, 128 }
 0x23e   : > { %v820_v44 = vadd.f32 %v819_v43, %v660_v41  ;;  %v821_v45 = vpop.f32.mrb[25].mxu1 }
 0x23f   : > { %v822_v47 = vadd.f32 %v821_v45, %v660_v41  ;;  %v823_v48 = vpop.f32.mrb[26].mxu1 }
 0x240   : > { %v856_v49 = vmax.f32 %v820_v44, 0.0  ;;  %v824_v50 = vadd.f32 %v823_v48, %v665_v46  ;;  %v825_v51 = vpop.f32.mrb[27].mxu1 }
 0x241   : > { %v857_v52 = vmax.f32 %v822_v47, 0.0  ;;  %v826_v53 = vadd.f32 %v825_v51, %v665_v46  ;;  %954 = vxpose.xlu0.b32.cont [12/16] %v871_v26, 128 }
 0x242   : > { %v858_v54 = vmax.f32 %v824_v50, 0.0 }
 0x243   : > { %v874_v55 = vadd.f32 %v857_v52, %v856_v49  ;;  %v859_v56 = vmax.f32 %v826_v53, 0.0 }
 0x245   : > { %v875_v57 = vadd.f32 %v859_v56, %v858_v54  ;;  %955 = vxpose.xlu0.b32.cont [13/16] %v872_v39, 128 }
 0x249   : > { %956 = vxpose.xlu0.b32.cont [14/16] %v873_v42, 128 }
 0x24d   : > { %957 = vxpose.xlu0.b32.cont [15/16] %v874_v55, 128 }
 0x251   : > { %958 = vxpose.xlu0.b32.end [16/16] %v875_v57, 128 }
 0x295   : > { %v959_v58 = vpop.trf.xlu0 }
 0x299   : > { %v960_v59 = vpop.trf.xlu0 }
 0x29a   : > { %v975_v4 = vadd.f32 %v960_v59, %v959_v58 }
 0x29d   : > { %v961_v60 = vpop.trf.xlu0 }
 0x29e   : > { %v976_v5 = vadd.f32 %v975_v4, %v961_v60 }
 0x2a1   : > { %v962_v61 = vpop.trf.xlu0 }
 0x2a2   : > { %v977_v7 = vadd.f32 %v976_v5, %v962_v61 }
 0x2a5   : > { %v963_v62 = vpop.trf.xlu0 }
 0x2a6   : > { %v978_v8 = vadd.f32 %v977_v7, %v963_v62 }
 0x2a9   : > { %v964_v63 = vpop.trf.xlu0 }
 0x2aa   : > { %v979_v9 = vadd.f32 %v978_v8, %v964_v63 }
 0x2ad   : > { %v965_v1 = vpop.trf.xlu0 }
 0x2ae   : > { %v980_v10 = vadd.f32 %v979_v9, %v965_v1 }
 0x2b1   : > { %v966_v2 = vpop.trf.xlu0 }
 0x2b2   : > { %v981_v12 = vadd.f32 %v980_v10, %v966_v2 }
 0x2b5   : > { %v967_v3 = vpop.trf.xlu0 }
 0x2b6   : > { %v982_v13 = vadd.f32 %v981_v12, %v967_v3 }
 0x2b9   : > { %v968_v6 = vpop.trf.xlu0 }
 0x2ba   : > { %v983_v15 = vadd.f32 %v982_v13, %v968_v6 }
 0x2bd   : > { %v969_v0 = vpop.trf.xlu0 }
 0x2be   : > { %v984_v16 = vadd.f32 %v983_v15, %v969_v0 }
 0x2c1   : > { %v970_v11 = vpop.trf.xlu0 }
 0x2c2   : > { %v985_v18 = vadd.f32 %v984_v16, %v970_v11 }
 0x2c5   : > { %v971_v14 = vpop.trf.xlu0 }
 0x2c6   : > { %v986_v19 = vadd.f32 %v985_v18, %v971_v14 }
 0x2c9   : > { %v972_v17 = vpop.trf.xlu0 }
 0x2ca   : > { %v987_v21 = vadd.f32 %v986_v19, %v972_v17 }
 0x2cd   : > { %v973_v20 = vpop.trf.xlu0 }
 0x2ce   : > { %v988_v22 = vadd.f32 %v987_v21, %v973_v20 }
 0x2d1   : > { %v974_v23 = vpop.trf.xlu0 }
 0x2d2   : > { %v989_v24 = vadd.f32 %v988_v22, %v974_v23 }
 0x2d4   : > { %v990_v25 = vrot.slane %v989_v24, 4 }
 0x2d6   : > { %v991_v26 = vadd.f32 %v990_v25, %v989_v24 }
 0x2d8   : > { %v992_v27 = vrot.slane %v991_v26, 2 }
 0x2da   : > { %v993_v28 = vadd.f32 %v992_v27, %v991_v26 }
 0x2dc   : > { %v994_v29 = vrot.slane %v993_v28, 1 }
 0x2de   : > { %v995_v30 = vadd.f32 %v994_v29, %v993_v28 }
 0x2e0   : > { %v996_v31 = vmul.f32 0.00390625, %v995_v30 }
 0x2e2   : > { %997 = vst [vmem:[%s253_s10] sm:$0x1] %v996_v31 }
 0x2e3   : > { %1260 = shalt.err (!%p1257_p5)
}
 0x2e4   : > { %s1261_s29 = scalar_lea.hbm %s1542_s14, 16  ;;  %s1265_s6 = scalar_lea.hbm %s1593_s4, 32 }
 0x2e5   : > { %p1262_p6 = scmp.ne.s32.totalorder %s1542_s14, %s1261_s29  ;;  %p1266_p10 = scmp.lt.u32.totalorder %s1542_s14, %s1593_s4 }
 0x2e6   : > { %p1267_p11 = scmp.lt.u32.totalorder %s1265_s6, %s1261_s29  ;;  %p1269_p13 = scmp.lt.u32.totalorder %s1261_s29, %s1542_s14 }
 0x2e7   : > { %p1263_p7 = pnand %p1262_p6, %p1395_p4 }
 0x2e8   : > { %p1268_p12 = por %p1267_p11, %p1266_p10 }
 0x2e9   : > { %p1264_p9 = pneg %p1263_p7 }
 0x2ea   : > { %p1270_p0 = por %p1269_p13, %p1268_p12 }
 0x2ec   : > { %p1271_p1 = pnand %p1270_p0, %p1264_p9 }
 0x2ee   : > { %1274 = shalt.err (!%p1271_p1)
}
 0x2ef   : > { %1170 = dma.vmem_to_hbm [thread:$0]  (%p1395_p4), %s1544_s11, 16, %s1542_s14, %s999_s21  }
 0x2f0 PF: > { %p1176_p2 = scmp.ge.s32.totalorder %s1325_s20, 2  ;;  %s1024_s9 = sand.u32 1, %s1305_s15  }
 0x2f1   : > { %s1025_s10 = scalar_lea.sflag [#allocation4], %s1024_s9 }
 0x2f2   : > { %p1173_p3 = pnand %p1176_p2, %p1402_p8 }
 0x2f4   : > { %1300 = dma.done.wait (!%p1173_p3), %s1025_s10, 16  }
 0x2f5   : > { %1302 = vsyncadd (!%p1173_p3), %s1025_s10, 4294967280  ;;  %s17_s20 = sadd.s32 1, %s1325_s20   ;;  %s1596_s15 = smov %s1309_s16 }
 0x2f6   : > { %p14_p5 = scmp.ge.s32.totalorder %s17_s20, 4   ;;  %s1597_s16 = smov %s1313_s17 }
 0x2f7   : > { %s1598_s17 = smov %s1408_s28  ;;  %s1599_s18 = smov %s1321_s19 }
 0x2f8   : > { %s1600_s19 = smov %s1602_s23  ;;  %16 = sbr.rel (!%p14_p5) target bundleno = 4 (0x4), region = 85 }
 0x2ff   :  { %1029 = vsyncpa [#allocation4], 1 }
 0x300   :  { %1031 = vsyncpa [#allocation4 + $0x1], 1 }

// kernel: tpu_custom_call.1
= control target key start
LH: loop header
LB: loop body
LE: loop exit
PB: predicated region body
PF: predicated region fallthrough
CT: control target
= control target key end

     0   :  { %9 = vsyncpa [#allocation4], 0  ;;  %s1589_s0 = inlined_call_operand.vmem [shape: bf16[2,5,256], index: 0, kind: input, shape index: {}]   ;;  %s1590_s1 = inlined_call_operand.vmem [shape: bf16[128,5], index: 1, kind: input, shape index: {}]   ;;  %s1591_s2 = inlined_call_operand.vmem [shape: bf16[128,128], index: 2, kind: input, shape index: {}]   ;;  %s1592_s3 = inlined_call_operand.vmem [shape: f32[128,1], index: 3, kind: input, shape index: {}]   ;;  %s1593_s4 = inlined_call_operand.hbm [shape: f32[2,1,128], index: 4, kind: output, shape index: {}]  }
   0x1   :  { %11 = vsyncpa [#allocation4 + $0x1], 0  ;;  %s1355_s15 = smov 0   ;;  %s1357_s16 = smov 0  }
   0x2   :  { %s1359_s17 = smov 0   ;;  %s1361_s18 = smov 0  }
   0x3   :  { %s1363_s19 = smov 0   ;;  %s1365_s20 = smov 0  }
   0x4 LB: > { %s1115_s21 = sadd.s32 4294967295, %s1325_s20   ;;  %s1116_s22 = sadd.s32 4294967294, %s1325_s20   ;;  %s1325_s20 = sphi %s1365_s20, %s17_s20   ;;  %s1321_s19 = sphi %s1363_s19, %s1600_s19   ;;  %s1317_s18 = sphi %s1361_s18, %s1599_s18   ;;  %s1313_s17 = sphi %s1359_s17, %s1598_s17   ;;  %s1309_s16 = sphi %s1357_s16, %s1597_s16   ;;  %s1305_s15 = sphi %s1355_s15, %s1596_s15  }
   0x5   : > { %s36_s23 = sadd.s32 1, %s1321_s19  ;;  %s146_s24 = sadd.s32 1, %s1313_s17 }
   0x6   : > { %p38_p0 = scmp.ge.s32.totalorder %s36_s23, 2  ;;  %p156_p1 = scmp.ne.s32.totalorder %s1313_s17, %s1309_s16 }
   0x7   : > { %p157_p2 = scmp.eq.s32.totalorder %s1115_s21, 1  ;;  %p162_p3 = scmp.ne.s32.totalorder %s1309_s16, %s1305_s15 }
   0x8   : > { %s1602_s23 = smov (%p38_p0, %s36_s23), 0  ;;  %p163_p5 = scmp.eq.s32.totalorder %s1116_s22, 1 }
   0x9   : > { %p1395_p4 = por %p157_p2, %p156_p1  ;;  %s141_s26 = ssub.s32 %s1321_s19, %s1602_s23 }
   0xa   : > { %p1121_p6 = scmp.ge.s32.totalorder %s1325_s20, 1  ;;  %p144_p7 = scmp.eq.s32.totalorder %s141_s26, 0 }
   0xb   : > { %p1402_p8 = por %p163_p5, %p162_p3  ;;  %p215_p9 = scmp.lt.s32.totalorder %s1325_s20, 3 }
   0xc   : > { %s1408_s28 = scalar_select %p144_p7, %s1313_s17, %s146_s24  }
   0xd   : > { %p216_p10 = pnand %p1121_p6, %p215_p9 }
   0xe   : > { %p255_p11 = scmp.lt.s32.totalorder (!%p216_p10), %s1317_s18, 1  ;;  %vm384_vm0 = vcmask (!%p216_p10), 1041408   ;;  %v1327_v0 = vmov (!%p216_p10), 0   ;;  %vm385_vm1 = vcmask (!%p216_p10), 1042432   ;;  %v1328_v1 = vmov (!%p216_p10), 65535   ;;  %v1231_v9 = vld [vmem:[%s1590_s1] sm:$0xff] (!%p216_p10)  }
   0xf   : > { %219 = sbr.rel (%p216_p10) target bundleno = 752 (0x2f0), region = 36  ;;  %426 = vmatprep.mubr.bf16.mxu0 (!%p216_p10), %v1327_v0  ;;  %757 = vmatprep.mubr.bf16.mxu1 (!%p216_p10), %v1327_v0  ;;  %v386_v2 = vsel (!%p216_p10), %vm384_vm0, 4294967295, %v1328_v1  ;;  %vm359_vm2 = vcmask (!%p216_p10), 39936   ;;  %v1232_v10 = vld [vmem:[%s1590_s1 + $0x8] sm:$0xff] (!%p216_p10)   ;;  %v1233_v11 = vld [vmem:[%s1590_s1 + $0x10] sm:$0xff] (!%p216_p10)   ;;  %v1234_v12 = vld [vmem:[%s1590_s1 + $0x18] sm:$0xff] (!%p216_p10)  }
  0x10   : > { %1227 = vset.pattern.permute.xlu0 (!%p216_p10), %v1327_v0  ;;  %1228 = vset.pattern.permute.xlu1 (!%p216_p10), %v1327_v0  ;;  %v387_v4 = vsel (!%p216_p10), %vm385_vm1, %v386_v2, 0  ;;  %v1235_v13 = vld [vmem:[%s1590_s1 + $0x20] sm:$0xff] (!%p216_p10)   ;;  %v1236_v14 = vld [vmem:[%s1590_s1 + $0x28] sm:$0xff] (!%p216_p10)   ;;  %v1237_v15 = vld [vmem:[%s1590_s1 + $0x30] sm:$0xff] (!%p216_p10)   ;;  %s252_s8 = sand.u32 (!%p216_p10), 1, %s1309_s16   ;;  %s1150_s9 = sshll.u32 (!%p216_p10), %s1317_s18, 4 }
  0x11   : > { %v1238_v16 = vld [vmem:[%s1590_s1 + $0x38] sm:$0xff] (!%p216_p10)   ;;  %v571_v17 = vld [vmem:[%s1592_s3] sm:$0xff] (!%p216_p10)  ;;  %v573_v18 = vld [vmem:[%s1592_s3 + $0x10] sm:$0xff] (!%p216_p10)  ;;  %s253_s10 = scalar_lea.vmem (!%p216_p10), [#allocation3], %s252_s8  ;;  %s1542_s14 = scalar_lea.hbm (!%p216_p10), %s1593_s4, %s1150_s9 }
  0x12   : > { %589 = vperm.xlu0 (!%p216_p10), %1227, %v571_v17   ;;  %599 = vperm.xlu1 (!%p216_p10), %1228, %v573_v18   ;;  %v572_v19 = vld [vmem:[%s1592_s3 + $0x8] sm:$0xff] (!%p216_p10)  ;;  %v574_v20 = vld [vmem:[%s1592_s3 + $0x18] sm:$0xff] (!%p216_p10)  ;;  %v575_v21 = vld [vmem:[%s1592_s3 + $0x20] sm:$0xff] (!%p216_p10)  ;;  %s1012_s11 = sshll.u32 (!%p216_p10), %s253_s10, 4  ;;  %s999_s21 = scalar_lea.sflag (!%p216_p10), [#allocation4], %s252_s8  ;;  %s1544_s11 = int_to_ptr.vmem [resolvable:$true] %s1012_s11 }
  0x13   : > { %v576_v22 = vld [vmem:[%s1592_s3 + $0x28] sm:$0xff] (!%p216_p10)  ;;  %v577_v23 = vld [vmem:[%s1592_s3 + $0x30] sm:$0xff] (!%p216_p10)  ;;  %v578_v24 = vld [vmem:[%s1592_s3 + $0x38] sm:$0xff] (!%p216_p10)  ;;  %s1247_s22 = scalar_lea.vmem (!%p216_p10), %s1544_s11, 16 }
  0x14   : > { %v579_v28 = vld [vmem:[%s1592_s3 + $0x40] sm:$0xff] (!%p216_p10)  ;;  %v580_v29 = vld [vmem:[%s1592_s3 + $0x48] sm:$0xff] (!%p216_p10)  ;;  %v581_v37 = vld [vmem:[%s1592_s3 + $0x50] sm:$0xff] (!%p216_p10)  ;;  %p1248_p12 = scmp.ne.s32.totalorder (!%p216_p10), %s1544_s11, %s1247_s22 }
  0x15   : > { %v582_v38 = vld [vmem:[%s1592_s3 + $0x58] sm:$0xff] (!%p216_p10)  ;;  %v583_v45 = vld [vmem:[%s1592_s3 + $0x60] sm:$0xff] (!%p216_p10)  ;;  %v584_v46 = vld [vmem:[%s1592_s3 + $0x68] sm:$0xff] (!%p216_p10) }
  0x16   : > { %s256_s29 = scalar_select %p255_p11, %s1317_s18, 1  ;;  %594 = vperm.xlu0 %1227, %v572_v19   ;;  %604 = vperm.xlu1 %1228, %v574_v20   ;;  %v585_v51 = vld [vmem:[%s1592_s3 + $0x70] sm:$0xff]  ;;  %v586_v52 = vld [vmem:[%s1592_s3 + $0x78] sm:$0xff] }
  0x17   : > { %p1249_p13 = pnand %p1248_p12, %p1395_p4  ;;  %s1329_s18 = smov [#allocation3]  }
  0x18   : > { %s1153_s30 = sshll.u32 %s256_s29, 3  ;;  %s1251_s24 = sshll.u32 %s1329_s18, 4  ;;  %s1252_s24 = int_to_ptr.vmem [resolvable:$false] %s1251_s24 }
  0x19   : > { %s262_s7 = scalar_lea.vmem %s1589_s0, %s1153_s30  ;;  %p1250_p0 = pneg %p1249_p13 }
  0x1a   : > { %v297_v3 = vld [vmem:[%s262_s7] sm:$0x77]  ;;  %609 = vperm.xlu0 %1227, %v575_v21   ;;  %614 = vperm.xlu1 %1228, %v576_v22   ;;  %s1253_s26 = scalar_lea.vmem %s1252_s24, 32  ;;  %p1254_p1 = scmp.lt.s32.totalorder %s1544_s11, %s1252_s24 }
  0x1b   : > { %v1133_v5 = vcombine.high %v297_v3, %v297_v3  ;;  %v1132_v6 = vcombine.low %v297_v3, %v297_v3  ;;  %p1255_p2 = scmp.lt.s32.totalorder %s1253_s26, %s1247_s22 }
  0x1d   : > { %v392_v7 = vand.u32 %v1133_v5, %v387_v4  ;;  %v389_v8 = vand.u32 %v1132_v6, %v387_v4  ;;  %p1256_p3 = por %p1255_p2, %p1254_p1 }
  0x1e   : > { %619 = vperm.xlu0 %1227, %v577_v23   ;;  %624 = vperm.xlu1 %1228, %v578_v24  }
  0x1f   : > { %394 = vmatprep.subr.bf16.mxu0 %v392_v7  ;;  %p1257_p5 = pnand %p1256_p3, %p1250_p0 }
  0x20   : > { %395 = vmatpush1.bf16.msra.mxu0 %v389_v8 }
  0x22   : > { %629 = vperm.xlu0 %1227, %v579_v28   ;;  %634 = vperm.xlu1 %1228, %v580_v29  }
  0x23   : > { %1134 = vmatmul.mubr.msk.bf16.vlgmr.msra.gmra.mrb[0].mxu0 %vm359_vm2, %v1231_v9 }
  0x24   : > { %436 = vmatprep.mubr.bf16.mxu0 %v1327_v0 }
  0x26   : > { %639 = vperm.xlu0 %1227, %v581_v37   ;;  %644 = vperm.xlu1 %1228, %v582_v38  }
  0x2a   : > { %649 = vperm.xlu0 %1227, %v583_v45   ;;  %654 = vperm.xlu1 %1228, %v584_v46  }
  0x2b   : > { %1135 = vmatmul.mubr.msk.bf16.gmra.mrb[4].mxu0 %vm359_vm2, %v1232_v10 }
  0x2c   : > { %446 = vmatprep.mubr.bf16.mxu0 %v1327_v0 }
  0x2e   : > { %659 = vperm.xlu0 %1227, %v585_v51   ;;  %664 = vperm.xlu1 %1228, %v586_v52   ;;  %v1240_v51 = vld [vmem:[%s1591_s2 + $0x8] sm:$0xff]   ;;  %v1241_v52 = vld [vmem:[%s1591_s2 + $0x10] sm:$0xff]  }
  0x33   : > { %1136 = vmatmul.mubr.msk.bf16.gmra.mrb[8].mxu0 %vm359_vm2, %v1233_v11 }
  0x34   : > { %456 = vmatprep.mubr.bf16.mxu0 %v1327_v0 }
  0x3b   : > { %1137 = vmatmul.mubr.msk.bf16.gmra.mrb[12].mxu0 %vm359_vm2, %v1234_v12 }
  0x3c   : > { %466 = vmatprep.mubr.bf16.mxu0 %v1327_v0 }
  0x43   : > { %1138 = vmatmul.mubr.msk.bf16.gmra.mrb[16].mxu0 %vm359_vm2, %v1235_v13 }
  0x44   : > { %476 = vmatprep.mubr.bf16.mxu0 %v1327_v0 }
  0x4b   : > { %1139 = vmatmul.mubr.msk.bf16.gmra.mrb[20].mxu0 %vm359_vm2, %v1236_v14 }
  0x4c   : > { %486 = vmatprep.mubr.bf16.mxu0 %v1327_v0 }
  0x53   : > { %1140 = vmatmul.mubr.msk.bf16.gmra.mrb[24].mxu0 %vm359_vm2, %v1237_v15 }
  0x54   : > { %496 = vmatprep.mubr.bf16.mxu0 %v1327_v0 }
  0x5b   : > { %1141 = vmatmul.mubr.msk.bf16.gmra.mrb[28].mxu0 %vm359_vm2, %v1238_v16 }
  0x5c   : > { %747 = vmatprep.mubr.bf16.mxu0 %v1327_v0 }
  0xf6   : > { %v428_v25 = vpop.f32.mrb[0].mxu0 }
  0xf7   : > { %v430_v26 = vpop.f32.mrb[1].mxu0  ;;  %v507_v30 = vmax.f32 %v428_v25, 0.0 }
  0xf8   : > { %v432_v27 = vpop.f32.mrb[2].mxu0  ;;  %v508_v33 = vmax.f32 %v430_v26, 0.0 }
  0xf9   : > { %v509_v31 = vmax.f32 %v432_v27, 0.0  ;;  %v434_v32 = vpop.f32.mrb[3].mxu0 }
  0xfa   : > { %v510_v34 = vmax.f32 %v434_v32, 0.0 }
  0xfb   : > { %v555_v35 = vpack.c.bf16 %v509_v31, %v507_v30 }
  0xfc   : > { %v556_v36 = vpack.c.bf16 %v510_v34, %v508_v33 }
  0xfe   : > { %v438_v39 = vpop.f32.mrb[4].mxu0  ;;  %715 = vmatprep.subr.bf16.mxu0 %v556_v36  ;;  %1154 = vmatprep.subr.bf16.mxu1 %v556_v36 }
  0xff   : > { %v440_v40 = vpop.f32.mrb[5].mxu0  ;;  %716 = vmatpush1.bf16.msra.mxu0 %v555_v35  ;;  %1162 = vmatpush1.bf16.msra.mxu1 %v555_v35  ;;  %v511_v42 = vmax.f32 %v438_v39, 0.0 }
 0x100   : > { %v442_v41 = vpop.f32.mrb[6].mxu0  ;;  %v512_v47 = vmax.f32 %v440_v40, 0.0 }
 0x101   : > { %v513_v43 = vmax.f32 %v442_v41, 0.0  ;;  %v444_v44 = vpop.f32.mrb[7].mxu0 }
 0x102   : > { %v514_v48 = vmax.f32 %v444_v44, 0.0 }
 0x103   : > { %v557_v49 = vpack.c.bf16 %v513_v43, %v511_v42 }
 0x104   : > { %v558_v50 = vpack.c.bf16 %v514_v48, %v512_v47 }
 0x106   : > { %v448_v53 = vpop.f32.mrb[8].mxu0  ;;  %717 = vmatprep.subr.bf16.mxu0 %v558_v50  ;;  %1155 = vmatprep.subr.bf16.mxu1 %v558_v50  ;;  %v1239_v50 = vld [vmem:[%s1591_s2] sm:$0xff]  }
 0x107   : > { %v450_v54 = vpop.f32.mrb[9].mxu0  ;;  %718 = vmatpush1.bf16.msra.mxu0 %v557_v49  ;;  %1163 = vmatpush1.bf16.msra.mxu1 %v557_v49  ;;  %v515_v56 = vmax.f32 %v448_v53, 0.0  ;;  %v1242_v53 = vld [vmem:[%s1591_s2 + $0x18] sm:$0xff]  }
 0x108   : > { %v452_v55 = vpop.f32.mrb[10].mxu0  ;;  %v516_v59 = vmax.f32 %v450_v54, 0.0  ;;  %v1243_v54 = vld [vmem:[%s1591_s2 + $0x20] sm:$0xff]  }
 0x109   : > { %v517_v57 = vmax.f32 %v452_v55, 0.0  ;;  %v454_v58 = vpop.f32.mrb[11].mxu0  ;;  %v1244_v55 = vld [vmem:[%s1591_s2 + $0x28] sm:$0xff]  }
 0x10a   : > { %v518_v60 = vmax.f32 %v454_v58, 0.0  ;;  %v590_v58 = vpop.permute.xlu0 %589 }
 0x10b   : > { %v559_v61 = vpack.c.bf16 %v517_v57, %v515_v56  ;;  %v1245_v56 = vld [vmem:[%s1591_s2 + $0x30] sm:$0xff]   ;;  %v1246_v57 = vld [vmem:[%s1591_s2 + $0x38] sm:$0xff]  }
 0x10c   : > { %v560_v62 = vpack.c.bf16 %v518_v60, %v516_v59  ;;  %v600_v59 = vpop.permute.xlu1 %599 }
 0x10e   : > { %v458_v63 = vpop.f32.mrb[12].mxu0  ;;  %719 = vmatprep.subr.bf16.mxu0 %v560_v62  ;;  %1156 = vmatprep.subr.bf16.mxu1 %v560_v62  ;;  %v595_v60 = vpop.permute.xlu0 %594 }
 0x10f   : > { %v460_v1 = vpop.f32.mrb[13].mxu0  ;;  %720 = vmatpush1.bf16.msra.mxu0 %v559_v61  ;;  %1164 = vmatpush1.bf16.msra.mxu1 %v559_v61  ;;  %v519_v3 = vmax.f32 %v458_v63, 0.0 }
 0x110   : > { %v462_v2 = vpop.f32.mrb[14].mxu0  ;;  %v520_v6 = vmax.f32 %v460_v1, 0.0  ;;  %v605_v61 = vpop.permute.xlu1 %604 }
 0x111   : > { %v521_v4 = vmax.f32 %v462_v2, 0.0  ;;  %v464_v5 = vpop.f32.mrb[15].mxu0 }
 0x112   : > { %v522_v7 = vmax.f32 %v464_v5, 0.0 }
 0x113   : > { %v561_v8 = vpack.c.bf16 %v521_v4, %v519_v3 }
 0x114   : > { %v562_v9 = vpack.c.bf16 %v522_v7, %v520_v6 }
 0x116   : > { %v468_v10 = vpop.f32.mrb[16].mxu0  ;;  %721 = vmatprep.subr.bf16.mxu0 %v562_v9  ;;  %1157 = vmatprep.subr.bf16.mxu1 %v562_v9 }
 0x117   : > { %v470_v11 = vpop.f32.mrb[17].mxu0  ;;  %722 = vmatpush1.bf16.msra.mxu0 %v561_v8  ;;  %1165 = vmatpush1.bf16.msra.mxu1 %v561_v8  ;;  %v523_v13 = vmax.f32 %v468_v10, 0.0 }
 0x118   : > { %v472_v12 = vpop.f32.mrb[18].mxu0  ;;  %v524_v16 = vmax.f32 %v470_v11, 0.0 }
 0x119   : > { %v525_v14 = vmax.f32 %v472_v12, 0.0  ;;  %v474_v15 = vpop.f32.mrb[19].mxu0 }
 0x11a   : > { %v526_v17 = vmax.f32 %v474_v15, 0.0 }
 0x11b   : > { %v563_v18 = vpack.c.bf16 %v525_v14, %v523_v13 }
 0x11c   : > { %v564_v19 = vpack.c.bf16 %v526_v17, %v524_v16 }
 0x11e   : > { %v478_v20 = vpop.f32.mrb[20].mxu0  ;;  %723 = vmatprep.subr.bf16.mxu0 %v564_v19  ;;  %1158 = vmatprep.subr.bf16.mxu1 %v564_v19 }
 0x11f   : > { %v480_v21 = vpop.f32.mrb[21].mxu0  ;;  %724 = vmatpush1.bf16.msra.mxu0 %v563_v18  ;;  %1166 = vmatpush1.bf16.msra.mxu1 %v563_v18  ;;  %v527_v23 = vmax.f32 %v478_v20, 0.0 }
 0x120   : > { %v482_v22 = vpop.f32.mrb[22].mxu0  ;;  %v528_v26 = vmax.f32 %v480_v21, 0.0 }
 0x121   : > { %v529_v24 = vmax.f32 %v482_v22, 0.0  ;;  %v484_v25 = vpop.f32.mrb[23].mxu0 }
 0x122   : > { %v530_v27 = vmax.f32 %v484_v25, 0.0 }
 0x123   : > { %v565_v28 = vpack.c.bf16 %v529_v24, %v527_v23  ;;  %v610_v24 = vpop.permute.xlu0 %609 }
 0x124   : > { %v566_v29 = vpack.c.bf16 %v530_v27, %v528_v26 }
 0x126   : > { %v488_v30 = vpop.f32.mrb[24].mxu0  ;;  %725 = vmatprep.subr.bf16.mxu0 %v566_v29  ;;  %1159 = vmatprep.subr.bf16.mxu1 %v566_v29 }
 0x127   : > { %v490_v31 = vpop.f32.mrb[25].mxu0  ;;  %726 = vmatpush1.bf16.msra.mxu0 %v565_v28  ;;  %1167 = vmatpush1.bf16.msra.mxu1 %v565_v28  ;;  %v531_v33 = vmax.f32 %v488_v30, 0.0  ;;  %v615_v30 = vpop.permute.xlu1 %614 }
 0x128   : > { %v492_v32 = vpop.f32.mrb[26].mxu0  ;;  %v532_v36 = vmax.f32 %v490_v31, 0.0 }
 0x129   : > { %v533_v34 = vmax.f32 %v492_v32, 0.0  ;;  %v494_v35 = vpop.f32.mrb[27].mxu0 }
 0x12a   : > { %v534_v37 = vmax.f32 %v494_v35, 0.0 }
 0x12b   : > { %v567_v38 = vpack.c.bf16 %v533_v34, %v531_v33 }
 0x12c   : > { %v568_v39 = vpack.c.bf16 %v534_v37, %v532_v36 }
 0x12e   : > { %v498_v40 = vpop.f32.mrb[28].mxu0  ;;  %727 = vmatprep.subr.bf16.mxu0 %v568_v39  ;;  %1160 = vmatprep.subr.bf16.mxu1 %v568_v39 }
 0x12f   : > { %v500_v41 = vpop.f32.mrb[29].mxu0  ;;  %728 = vmatpush1.bf16.msra.mxu0 %v567_v38  ;;  %1168 = vmatpush1.bf16.msra.mxu1 %v567_v38  ;;  %v535_v43 = vmax.f32 %v498_v40, 0.0 }
 0x130   : > { %v502_v42 = vpop.f32.mrb[30].mxu0  ;;  %v536_v46 = vmax.f32 %v500_v41, 0.0  ;;  %v620_v41 = vpop.permute.xlu0 %619 }
 0x131   : > { %v537_v44 = vmax.f32 %v502_v42, 0.0  ;;  %v504_v45 = vpop.f32.mrb[31].mxu0 }
 0x132   : > { %v538_v47 = vmax.f32 %v504_v45, 0.0 }
 0x133   : > { %v569_v48 = vpack.c.bf16 %v537_v44, %v535_v43 }
 0x134   : > { %v570_v49 = vpack.c.bf16 %v538_v47, %v536_v46  ;;  %v625_v46 = vpop.permute.xlu1 %624 }
 0x136   : > { %729 = vmatprep.subr.bf16.mxu0 %v570_v49  ;;  %1161 = vmatprep.subr.bf16.mxu1 %v570_v49 }
 0x137   : > { %730 = vmatpush1.bf16.msra.mxu0 %v569_v48  ;;  %1169 = vmatpush1.bf16.msra.mxu1 %v569_v48 }
 0x13a   : > { %748 = vmatmul.mubr.bf16.vlgmr.msra.gmra.mrb[32].mxu0 %v1239_v50  ;;  %758 = vmatmul.mubr.bf16.vlgmr.msra.gmra.mrb[0].mxu1 %v1240_v51 }
 0x13b   : > { %767 = vmatprep.mubr.bf16.mxu1 %v1327_v0 }
 0x142   : > { %768 = vmatmul.mubr.bf16.gmra.mrb[4].mxu1 %v1241_v52 }
 0x143   : > { %777 = vmatprep.mubr.bf16.mxu1 %v1327_v0 }
 0x14a   : > { %778 = vmatmul.mubr.bf16.gmra.mrb[8].mxu1 %v1242_v53 }
 0x14b   : > { %787 = vmatprep.mubr.bf16.mxu1 %v1327_v0 }
 0x152   : > { %788 = vmatmul.mubr.bf16.gmra.mrb[12].mxu1 %v1243_v54 }
 0x153   : > { %797 = vmatprep.mubr.bf16.mxu1 %v1327_v0 }
 0x15a   : > { %798 = vmatmul.mubr.bf16.gmra.mrb[16].mxu1 %v1244_v55 }
 0x15b   : > { %807 = vmatprep.mubr.bf16.mxu1 %v1327_v0 }
 0x162   : > { %808 = vmatmul.mubr.bf16.gmra.mrb[20].mxu1 %v1245_v56 }
 0x163   : > { %817 = vmatprep.mubr.bf16.mxu1 %v1327_v0 }
 0x16a   : > { %818 = vmatmul.mubr.bf16.gmra.mrb[24].mxu1 %v1246_v57  ;;  %v630_v57 = vpop.permute.xlu0 %629 }
 0x20d   : > { %v749_v62 = vpop.f32.mrb[32].mxu0  ;;  %v759_v63 = vpop.f32.mrb[0].mxu1 }
 0x20e   : > { %v750_v1 = vadd.f32 %v749_v62, %v590_v58  ;;  %v751_v2 = vpop.f32.mrb[33].mxu0  ;;  %v760_v3 = vadd.f32 %v759_v63, %v600_v59  ;;  %v761_v4 = vpop.f32.mrb[1].mxu1 }
 0x20f   : > { %v752_v5 = vadd.f32 %v751_v2, %v590_v58  ;;  %v753_v6 = vpop.f32.mrb[34].mxu0  ;;  %v762_v7 = vadd.f32 %v761_v4, %v600_v59  ;;  %v763_v8 = vpop.f32.mrb[2].mxu1 }
 0x210   : > { %v828_v0 = vmax.f32 %v750_v1, 0.0  ;;  %v754_v9 = vadd.f32 %v753_v6, %v595_v60  ;;  %v832_v10 = vmax.f32 %v760_v3, 0.0  ;;  %v755_v11 = vpop.f32.mrb[35].mxu0  ;;  %v764_v12 = vadd.f32 %v763_v8, %v605_v61  ;;  %v765_v13 = vpop.f32.mrb[3].mxu1 }
 0x211   : > { %v829_v14 = vmax.f32 %v752_v5, 0.0  ;;  %v756_v15 = vadd.f32 %v755_v11, %v595_v60  ;;  %v833_v16 = vmax.f32 %v762_v7, 0.0  ;;  %v766_v17 = vadd.f32 %v765_v13, %v605_v61  ;;  %v635_v62 = vpop.permute.xlu1 %634 }
 0x212   : > { %v830_v18 = vmax.f32 %v754_v9, 0.0  ;;  %v834_v19 = vmax.f32 %v764_v12, 0.0  ;;  %v640_v9 = vpop.permute.xlu0 %639 }
 0x213   : > { %v860_v20 = vadd.f32 %v829_v14, %v828_v0  ;;  %v831_v21 = vmax.f32 %v756_v15, 0.0  ;;  %v862_v22 = vadd.f32 %v833_v16, %v832_v10  ;;  %v835_v23 = vmax.f32 %v766_v17, 0.0 }
 0x215   : > { %v861_v25 = vadd.f32 %v831_v21, %v830_v18  ;;  %v863_v26 = vadd.f32 %v835_v23, %v834_v19  ;;  %v769_v27 = vpop.f32.mrb[4].mxu1  ;;  %943 = vxpose.xlu0.b32.start [1/16] %v860_v20, 128  ;;  %v645_v14 = vpop.permute.xlu1 %644 }
 0x216   : > { %v770_v28 = vadd.f32 %v769_v27, %v610_v24  ;;  %v771_v29 = vpop.f32.mrb[5].mxu1 }
 0x217   : > { %v772_v31 = vadd.f32 %v771_v29, %v610_v24  ;;  %v773_v32 = vpop.f32.mrb[6].mxu1 }
 0x218   : > { %v836_v33 = vmax.f32 %v770_v28, 0.0  ;;  %v774_v34 = vadd.f32 %v773_v32, %v615_v30  ;;  %v775_v35 = vpop.f32.mrb[7].mxu1 }
 0x219   : > { %v837_v36 = vmax.f32 %v772_v31, 0.0  ;;  %944 = vxpose.xlu0.b32.cont [2/16] %v861_v25, 128  ;;  %v776_v37 = vadd.f32 %v775_v35, %v615_v30  ;;  %v650_v25 = vpop.permute.xlu0 %649  ;;  %v655_v30 = vpop.permute.xlu1 %654 }
 0x21a   : > { %v838_v38 = vmax.f32 %v774_v34, 0.0 }
 0x21b   : > { %v864_v39 = vadd.f32 %v837_v36, %v836_v33  ;;  %v839_v40 = vmax.f32 %v776_v37, 0.0 }
 0x21d   : > { %v865_v42 = vadd.f32 %v839_v40, %v838_v38  ;;  %v779_v43 = vpop.f32.mrb[8].mxu1  ;;  %945 = vxpose.xlu0.b32.cont [3/16] %v862_v22, 128 }
 0x21e   : > { %v780_v44 = vadd.f32 %v779_v43, %v620_v41  ;;  %v781_v45 = vpop.f32.mrb[9].mxu1 }
 0x21f   : > { %v782_v47 = vadd.f32 %v781_v45, %v620_v41  ;;  %v783_v48 = vpop.f32.mrb[10].mxu1  ;;  %v660_v41 = vpop.permute.xlu0 %659 }
 0x220   : > { %v840_v49 = vmax.f32 %v780_v44, 0.0  ;;  %v784_v50 = vadd.f32 %v783_v48, %v625_v46  ;;  %v785_v51 = vpop.f32.mrb[11].mxu1 }
 0x221   : > { %v841_v52 = vmax.f32 %v782_v47, 0.0  ;;  %v786_v53 = vadd.f32 %v785_v51, %v625_v46  ;;  %946 = vxpose.xlu0.b32.cont [4/16] %v863_v26, 128  ;;  %v665_v46 = vpop.permute.xlu1 %664 }
 0x222   : > { %v842_v54 = vmax.f32 %v784_v50, 0.0 }
 0x223   : > { %v866_v55 = vadd.f32 %v841_v52, %v840_v49  ;;  %v843_v56 = vmax.f32 %v786_v53, 0.0 }
 0x225   : > { %v867_v58 = vadd.f32 %v843_v56, %v842_v54  ;;  %v789_v59 = vpop.f32.mrb[12].mxu1  ;;  %947 = vxpose.xlu0.b32.cont [5/16] %v864_v39, 128 }
 0x226   : > { %v790_v60 = vadd.f32 %v789_v59, %v630_v57  ;;  %v791_v61 = vpop.f32.mrb[13].mxu1 }
 0x227   : > { %v792_v63 = vadd.f32 %v791_v61, %v630_v57  ;;  %v793_v1 = vpop.f32.mrb[14].mxu1 }
 0x228   : > { %v844_v2 = vmax.f32 %v790_v60, 0.0  ;;  %v794_v3 = vadd.f32 %v793_v1, %v635_v62  ;;  %v795_v4 = vpop.f32.mrb[15].mxu1 }
 0x229   : > { %v845_v5 = vmax.f32 %v792_v63, 0.0  ;;  %v796_v6 = vadd.f32 %v795_v4, %v635_v62  ;;  %948 = vxpose.xlu0.b32.cont [6/16] %v865_v42, 128 }
 0x22a   : > { %v846_v7 = vmax.f32 %v794_v3, 0.0 }
 0x22b   : > { %v868_v8 = vadd.f32 %v845_v5, %v844_v2  ;;  %v847_v0 = vmax.f32 %v796_v6, 0.0 }
 0x22d   : > { %v869_v10 = vadd.f32 %v847_v0, %v846_v7  ;;  %v799_v11 = vpop.f32.mrb[16].mxu1  ;;  %949 = vxpose.xlu0.b32.cont [7/16] %v866_v55, 128 }
 0x22e   : > { %v800_v12 = vadd.f32 %v799_v11, %v640_v9  ;;  %v801_v13 = vpop.f32.mrb[17].mxu1 }
 0x22f   : > { %v802_v15 = vadd.f32 %v801_v13, %v640_v9  ;;  %v803_v16 = vpop.f32.mrb[18].mxu1 }
 0x230   : > { %v848_v17 = vmax.f32 %v800_v12, 0.0  ;;  %v804_v18 = vadd.f32 %v803_v16, %v645_v14  ;;  %v805_v19 = vpop.f32.mrb[19].mxu1 }
 0x231   : > { %v849_v20 = vmax.f32 %v802_v15, 0.0  ;;  %v806_v21 = vadd.f32 %v805_v19, %v645_v14  ;;  %950 = vxpose.xlu0.b32.cont [8/16] %v867_v58, 128 }
 0x232   : > { %v850_v22 = vmax.f32 %v804_v18, 0.0 }
 0x233   : > { %v870_v23 = vadd.f32 %v849_v20, %v848_v17  ;;  %v851_v24 = vmax.f32 %v806_v21, 0.0 }
 0x235   : > { %v871_v26 = vadd.f32 %v851_v24, %v850_v22  ;;  %v809_v27 = vpop.f32.mrb[20].mxu1  ;;  %951 = vxpose.xlu0.b32.cont [9/16] %v868_v8, 128 }
 0x236   : > { %v810_v28 = vadd.f32 %v809_v27, %v650_v25  ;;  %v811_v29 = vpop.f32.mrb[21].mxu1 }
 0x237   : > { %v812_v31 = vadd.f32 %v811_v29, %v650_v25  ;;  %v813_v32 = vpop.f32.mrb[22].mxu1 }
 0x238   : > { %v852_v33 = vmax.f32 %v810_v28, 0.0  ;;  %v814_v34 = vadd.f32 %v813_v32, %v655_v30  ;;  %v815_v35 = vpop.f32.mrb[23].mxu1 }
 0x239   : > { %v853_v36 = vmax.f32 %v812_v31, 0.0  ;;  %v816_v37 = vadd.f32 %v815_v35, %v655_v30  ;;  %952 = vxpose.xlu0.b32.cont [10/16] %v869_v10, 128 }
 0x23a   : > { %v854_v38 = vmax.f32 %v814_v34, 0.0 }
 0x23b   : > { %v872_v39 = vadd.f32 %v853_v36, %v852_v33  ;;  %v855_v40 = vmax.f32 %v816_v37, 0.0 }
 0x23d   : > { %v873_v42 = vadd.f32 %v855_v40, %v854_v38  ;;  %v819_v43 = vpop.f32.mrb[24].mxu1  ;;  %953 = vxpose.xlu0.b32.cont [11/16] %v870_v23, 128 }
 0x23e   : > { %v820_v44 = vadd.f32 %v819_v43, %v660_v41  ;;  %v821_v45 = vpop.f32.mrb[25].mxu1 }
 0x23f   : > { %v822_v47 = vadd.f32 %v821_v45, %v660_v41  ;;  %v823_v48 = vpop.f32.mrb[26].mxu1 }
 0x240   : > { %v856_v49 = vmax.f32 %v820_v44, 0.0  ;;  %v824_v50 = vadd.f32 %v823_v48, %v665_v46  ;;  %v825_v51 = vpop.f32.mrb[27].mxu1 }
 0x241   : > { %v857_v52 = vmax.f32 %v822_v47, 0.0  ;;  %v826_v53 = vadd.f32 %v825_v51, %v665_v46  ;;  %954 = vxpose.xlu0.b32.cont [12/16] %v871_v26, 128 }
 0x242   : > { %v858_v54 = vmax.f32 %v824_v50, 0.0 }
 0x243   : > { %v874_v55 = vadd.f32 %v857_v52, %v856_v49  ;;  %v859_v56 = vmax.f32 %v826_v53, 0.0 }
 0x245   : > { %v875_v57 = vadd.f32 %v859_v56, %v858_v54  ;;  %955 = vxpose.xlu0.b32.cont [13/16] %v872_v39, 128 }
 0x249   : > { %956 = vxpose.xlu0.b32.cont [14/16] %v873_v42, 128 }
 0x24d   : > { %957 = vxpose.xlu0.b32.cont [15/16] %v874_v55, 128 }
 0x251   : > { %958 = vxpose.xlu0.b32.end [16/16] %v875_v57, 128 }
 0x295   : > { %v959_v58 = vpop.trf.xlu0 }
 0x299   : > { %v960_v59 = vpop.trf.xlu0 }
 0x29a   : > { %v975_v4 = vadd.f32 %v960_v59, %v959_v58 }
 0x29d   : > { %v961_v60 = vpop.trf.xlu0 }
 0x29e   : > { %v976_v5 = vadd.f32 %v975_v4, %v961_v60 }
 0x2a1   : > { %v962_v61 = vpop.trf.xlu0 }
 0x2a2   : > { %v977_v7 = vadd.f32 %v976_v5, %v962_v61 }
 0x2a5   : > { %v963_v62 = vpop.trf.xlu0 }
 0x2a6   : > { %v978_v8 = vadd.f32 %v977_v7, %v963_v62 }
 0x2a9   : > { %v964_v63 = vpop.trf.xlu0 }
 0x2aa   : > { %v979_v9 = vadd.f32 %v978_v8, %v964_v63 }
 0x2ad   : > { %v965_v1 = vpop.trf.xlu0 }
 0x2ae   : > { %v980_v10 = vadd.f32 %v979_v9, %v965_v1 }
 0x2b1   : > { %v966_v2 = vpop.trf.xlu0 }
 0x2b2   : > { %v981_v12 = vadd.f32 %v980_v10, %v966_v2 }
 0x2b5   : > { %v967_v3 = vpop.trf.xlu0 }
 0x2b6   : > { %v982_v13 = vadd.f32 %v981_v12, %v967_v3 }
 0x2b9   : > { %v968_v6 = vpop.trf.xlu0 }
 0x2ba   : > { %v983_v15 = vadd.f32 %v982_v13, %v968_v6 }
 0x2bd   : > { %v969_v0 = vpop.trf.xlu0 }
 0x2be   : > { %v984_v16 = vadd.f32 %v983_v15, %v969_v0 }
 0x2c1   : > { %v970_v11 = vpop.trf.xlu0 }
 0x2c2   : > { %v985_v18 = vadd.f32 %v984_v16, %v970_v11 }
 0x2c5   : > { %v971_v14 = vpop.trf.xlu0 }
 0x2c6   : > { %v986_v19 = vadd.f32 %v985_v18, %v971_v14 }
 0x2c9   : > { %v972_v17 = vpop.trf.xlu0 }
 0x2ca   : > { %v987_v21 = vadd.f32 %v986_v19, %v972_v17 }
 0x2cd   : > { %v973_v20 = vpop.trf.xlu0 }
 0x2ce   : > { %v988_v22 = vadd.f32 %v987_v21, %v973_v20 }
 0x2d1   : > { %v974_v23 = vpop.trf.xlu0 }
 0x2d2   : > { %v989_v24 = vadd.f32 %v988_v22, %v974_v23 }
 0x2d4   : > { %v990_v25 = vrot.slane %v989_v24, 4 }
 0x2d6   : > { %v991_v26 = vadd.f32 %v990_v25, %v989_v24 }
 0x2d8   : > { %v992_v27 = vrot.slane %v991_v26, 2 }
 0x2da   : > { %v993_v28 = vadd.f32 %v992_v27, %v991_v26 }
 0x2dc   : > { %v994_v29 = vrot.slane %v993_v28, 1 }
 0x2de   : > { %v995_v30 = vadd.f32 %v994_v29, %v993_v28 }
 0x2e0   : > { %v996_v31 = vmul.f32 0.00390625, %v995_v30 }
 0x2e2   : > { %997 = vst [vmem:[%s253_s10] sm:$0x1] %v996_v31 }
 0x2e3   : > { %1260 = shalt.err (!%p1257_p5)
}
 0x2e4   : > { %s1261_s29 = scalar_lea.hbm %s1542_s14, 16  ;;  %s1265_s6 = scalar_lea.hbm %s1593_s4, 32 }
 0x2e5   : > { %p1262_p6 = scmp.ne.s32.totalorder %s1542_s14, %s1261_s29  ;;  %p1266_p10 = scmp.lt.u32.totalorder %s1542_s14, %s1593_s4 }
 0x2e6   : > { %p1267_p11 = scmp.lt.u32.totalorder %s1265_s6, %s1261_s29  ;;  %p1269_p13 = scmp.lt.u32.totalorder %s1261_s29, %s1542_s14 }
 0x2e7   : > { %p1263_p7 = pnand %p1262_p6, %p1395_p4 }
 0x2e8   : > { %p1268_p12 = por %p1267_p11, %p1266_p10 }
 0x2e9   : > { %p1264_p9 = pneg %p1263_p7 }
 0x2ea   : > { %p1270_p0 = por %p1269_p13, %p1268_p12 }
 0x2ec   : > { %p1271_p1 = pnand %p1270_p0, %p1264_p9 }
 0x2ee   : > { %1274 = shalt.err (!%p1271_p1)
}
 0x2ef   : > { %1170 = dma.vmem_to_hbm [thread:$0]  (%p1395_p4), %s1544_s11, 16, %s1542_s14, %s999_s21  }
 0x2f0 PF: > { %p1176_p2 = scmp.ge.s32.totalorder %s1325_s20, 2  ;;  %s1024_s9 = sand.u32 1, %s1305_s15  }
 0x2f1   : > { %s1025_s10 = scalar_lea.sflag [#allocation4], %s1024_s9 }
 0x2f2   : > { %p1173_p3 = pnand %p1176_p2, %p1402_p8 }
 0x2f4   : > { %1300 = dma.done.wait (!%p1173_p3), %s1025_s10, 16  }
 0x2f5   : > { %1302 = vsyncadd (!%p1173_p3), %s1025_s10, 4294967280  ;;  %s17_s20 = sadd.s32 1, %s1325_s20   ;;  %s1596_s15 = smov %s1309_s16 }
 0x2f6   : > { %p14_p5 = scmp.ge.s32.totalorder %s17_s20, 4   ;;  %s1597_s16 = smov %s1313_s17 }
 0x2f7   : > { %s1598_s17 = smov %s1408_s28  ;;  %s1599_s18 = smov %s1321_s19 }
 0x2f8   : > { %s1600_s19 = smov %s1602_s23  ;;  %16 = sbr.rel (!%p14_p5) target bundleno = 4 (0x4), region = 85 }
 0x2ff   :  { %1029 = vsyncpa [#allocation4], 1 }
 0x300   :  { %1031 = vsyncpa [#allocation4 + $0x1], 1 }

</bundles_post_ra>
